<compile_context>
chip_gen: v7x
topology: tpu7x:2x2x1
jax: 0.10.0
libtpu: 0.0.40
codegen_flags: <defaults>
</compile_context>

<pallas_src>
import functools
from math import sqrt

import jax
import jax.numpy as jnp
from jax import lax
from jax.experimental import pallas as pl
from jax.experimental.pallas import tpu as pltpu


# contract lhs dim 1 with rhs dim 1  ->  x @ W.T  (PyTorch Linear semantics)
_TRANS_B = (((1,), (1,)), ((), ()))


def _attention_kernel(x_ref, wq_ref, wkv_ref, wo_ref, bo_ref, o_ref, kv_scr,
                      *, n_heads, inv_scale, q_tile):
    # x_ref  : (1, L, D)   full sequence for this batch element (input dtype)
    # wq_ref : (D, D)      W_q, PyTorch (out, in)
    # wkv_ref: (2D, D)     [W_k; W_v] stacked on the output dim
    # wo_ref : (D, D)      W_o; bo_ref: (1, D)
    # o_ref  : (1, TQ, D)  output tile
    # kv_scr : (L, 2D)     VMEM, persists across the query-tile grid axis
    qi = pl.program_id(1)
    compute_dtype = x_ref.dtype
    D = x_ref.shape[-1]
    d = D // n_heads

    # ---- fused K/V projection: once per batch element, reused by all q tiles
    @pl.when(qi == 0)
    def _():
        x_full = x_ref[0]                                           # (L, D)
        kv = lax.dot_general(x_full, wkv_ref[...], _TRANS_B,
                             preferred_element_type=jnp.float32)    # (L, 2D)
        kv_scr[...] = kv.astype(kv_scr.dtype)

    # ---- Q projection for this tile (sliced from the resident x block) ------
    q_start = pl.multiple_of(qi * q_tile, q_tile)
    xq = x_ref[0, pl.ds(q_start, q_tile), :]                        # (TQ, D)
    q = lax.dot_general(xq, wq_ref[...], _TRANS_B,
                        preferred_element_type=jnp.float32)
    q = (q * inv_scale).astype(compute_dtype)                       # (TQ, D)

    # ---- per-head attention; head results stay in registers -----------------
    # Static unroll is fine for small H; for H >= 8 switch to lax.fori_loop to
    # bound live ranges (see review note on spill pressure).
    head_outs = []
    for h in range(n_heads):
        qh = q[:, h * d:(h + 1) * d]                                # (TQ, d)
        kh = kv_scr[:, h * d:(h + 1) * d]                           # (L,  d)
        vh = kv_scr[:, D + h * d:D + (h + 1) * d]                   # (L,  d)

        # scores: trans-B contraction of head dims (no XLU transpose)
        s = lax.dot_general(qh, kh, _TRANS_B,
                            preferred_element_type=jnp.float32)     # (TQ, L)
        s = s - jnp.max(s, axis=-1, keepdims=True)
        p = jnp.exp(s)
        denom = jnp.sum(p, axis=-1, keepdims=True)                  # (TQ, 1)
        hout = jnp.dot(p.astype(compute_dtype), vh,
                       preferred_element_type=jnp.float32)          # (TQ, d)
        head_outs.append(hout * pl.reciprocal(denom, approx=True))

    # one lane-concatenation feeding the output projection directly
    ctx = jnp.concatenate(head_outs, axis=-1).astype(compute_dtype)  # (TQ, D)

    out = lax.dot_general(ctx, wo_ref[...], _TRANS_B,
                          preferred_element_type=jnp.float32)        # (TQ, D)
    out = out + bo_ref[...].astype(jnp.float32)
    o_ref[0] = out.astype(o_ref.dtype)


def _pick_query_tile(L):
    for t in (256, 128):
        if L % t == 0:
            return t
    return L  # small / ragged L: one tile spanning the full sequence


def _vmem_capacity_bytes():
    try:
        cap = getattr(pltpu.get_tpu_info(), "vmem_capacity_bytes", None)
        if cap:
            return int(cap)
    except Exception:
        pass
    return 64 * 1024 * 1024  # conservative: v7x per-core VMEM


def _attention_pallas_call(x, wq, wk, wv, wo, bo, *, n_heads, tq,
                           single_buffer_resident):
    B, L, D = x.shape
    n_q_tiles = L // tq
    inv_scale = 1.0 / sqrt(D // n_heads)

    w_kv = jnp.concatenate([wk, wv], axis=0)        # (2D, D), PyTorch (out, in)
    bo2 = bo.reshape(1, D)

    kernel = functools.partial(_attention_kernel, n_heads=n_heads,
                               inv_scale=inv_scale, q_tile=tq)

    def resident_spec(block_shape, index_map):
        # Block index never changes along the inner grid axis -> single-buffer.
        if single_buffer_resident:
            return pl.BlockSpec(block_shape, index_map,
                                pipeline_mode=pl.Buffered(1))
        return pl.BlockSpec(block_shape, index_map)

    const = lambda b, qi: (0, 0)

    # VMEM footprint estimate: single-buffered weights + x, double-buffered
    # output tile, (L, 2D) KV scratch, f32 temporaries (q, s/p, head outs, kv).
    itemsize = x.dtype.itemsize
    est = (4 * D * D * itemsize                 # wq + wkv + wo
           + L * D * itemsize                   # x block
           + 2 * tq * D * itemsize              # out tile (double-buffered)
           + 2 * L * D * itemsize               # kv scratch
           + (2 * tq * L + 6 * tq * D + 2 * L * D) * 4)   # f32 temporaries
    cap = _vmem_capacity_bytes()
    vmem_limit = int(min(int(0.85 * cap), max(32 * 1024 * 1024, 2 * est)))

    return pl.pallas_call(
        kernel,
        out_shape=jax.ShapeDtypeStruct((B, L, D), x.dtype),
        grid_spec=pltpu.PrefetchScalarGridSpec(
            num_scalar_prefetch=0,
            grid=(B, n_q_tiles),
            in_specs=[
                resident_spec((1, L, D), lambda b, qi: (b, 0, 0)),  # x (full seq)
                resident_spec((D, D), const),                       # W_q
                resident_spec((2 * D, D), const),                   # [W_k; W_v]
                resident_spec((D, D), const),                       # W_o
                resident_spec((1, D), const),                       # b_o
            ],
            out_specs=pl.BlockSpec((1, tq, D), lambda b, qi: (b, qi, 0)),
            scratch_shapes=[
                pltpu.VMEM((L, 2 * D), x.dtype),   # K | V (compute dtype)
            ],
        ),
        compiler_params=pltpu.CompilerParams(
            # query-tile axis carries the KV scratch -> "arbitrary"
            dimension_semantics=("parallel", "arbitrary"),
            vmem_limit_bytes=vmem_limit,
        ),
    )(x, wq, w_kv, wo, bo2)


def attention_pallas(x, wq, wk, wv, wo, bo, *, n_heads, q_tile=None):
    """x: (B, L, D). wq/wk/wv/wo: (D, D) PyTorch (out, in) weights.
    bo: (D,) bias of W_o. Returns (B, L, D)."""
    B, L, D = x.shape
    assert D % n_heads == 0, "d_model must be divisible by n_heads"
    tq = q_tile if q_tile is not None else _pick_query_tile(L)
    assert L % tq == 0, "sequence length must be divisible by the query tile"
    # sublane alignment depends on packing: 8 rows/vreg for f32, 16 for bf16
    min_sub = max(8, 32 // jnp.dtype(x.dtype).itemsize)
    assert tq == L or tq % min_sub == 0, "query tile must be sublane-aligned"

    try:
        return _attention_pallas_call(x, wq, wk, wv, wo, bo, n_heads=n_heads,
                                      tq=tq, single_buffer_resident=True)
    except Exception:
        # Fallback for JAX builds where pipeline_mode=pl.Buffered(1) is not
        # accepted by the TPU lowering: identical kernel, default buffering.
        return _attention_pallas_call(x, wq, wk, wv, wo, bo, n_heads=n_heads,
                                      tq=tq, single_buffer_resident=False)


def attention_reference(x, wq, wk, wv, wo, bo, *, n_heads):
    """Pure-JAX reference mirroring the PyTorch forward exactly."""
    B, L, D = x.shape
    d = D // n_heads
    scale = sqrt(d)
    q = x @ wq.T
    k = x @ wk.T
    v = x @ wv.T
    # 'b l (n d) -> b n l d'
    q = q.reshape(B, L, n_heads, d).transpose(0, 2, 1, 3)
    k = k.reshape(B, L, n_heads, d).transpose(0, 2, 1, 3)
    v = v.reshape(B, L, n_heads, d).transpose(0, 2, 1, 3)
    attn = jnp.einsum("bnld,bnmd->bnlm", q, k) / scale
    p = jax.nn.softmax(attn, axis=-1)
    ctx = jnp.einsum("bnlm,bnmd->bnld", p, v)
    ctx = ctx.transpose(0, 2, 1, 3).reshape(B, L, D)
    return ctx @ wo.T + bo


if __name__ == "__main__":
    def run_case(key, B, L, D, H, q_tile=None):
        kx, kq, kk, kv, ko, kb = jax.random.split(key, 6)
        x = jax.random.normal(kx, (B, L, D), dtype=jnp.float32)
        # Deterministic synthetic parameters (PyTorch Linear weight shape: (out, in)).
        wq = jax.random.normal(kq, (D, D), dtype=jnp.float32) * 0.1
        wk = jax.random.normal(kk, (D, D), dtype=jnp.float32) * 0.1
        wv = jax.random.normal(kv, (D, D), dtype=jnp.float32) * 0.1
        wo = jax.random.normal(ko, (D, D), dtype=jnp.float32) * 0.1
        bo = jax.random.normal(kb, (D,), dtype=jnp.float32) * 0.1

        out = attention_pallas(x, wq, wk, wv, wo, bo, n_heads=H, q_tile=q_tile)
        out = jax.block_until_ready(out)
        ref = attention_reference(x, wq, wk, wv, wo, bo, n_heads=H)
        assert out.shape == (B, L, D)
        # tolerance accounts for the EUP approximate reciprocal in the softmax
        assert jnp.allclose(out, ref, atol=5e-3, rtol=5e-3), \
            f"mismatch vs reference at B={B} L={L} D={D} H={H}"

    key = jax.random.PRNGKey(0)
    k1, k2 = jax.random.split(key)

    # Small shape implied by the module spec (single query tile).
    run_case(k1, B=2, L=8, D=32, H=4)
    # Larger shape exercising the tiled query axis + resident KV scratch reuse.
    run_case(k2, B=2, L=256, D=128, H=4, q_tile=128)

    print("KERNEL_OK")
</pallas_src>

<mosaic_0001>
module attributes {stable_mosaic.version = 11 : i64} {
  func.func @_attention_kernel(%arg0: i32, %arg1: i32, %arg2: memref<1x8x32xf32, #tpu.memory_space<vmem>>, %arg3: memref<32x32xf32, #tpu.memory_space<vmem>>, %arg4: memref<64x32xf32, #tpu.memory_space<vmem>>, %arg5: memref<32x32xf32, #tpu.memory_space<vmem>>, %arg6: memref<1x32xf32, #tpu.memory_space<vmem>>, %arg7: memref<1x8x32xf32, #tpu.memory_space<vmem>>, %arg8: memref<8x64xf32, #tpu.memory_space<vmem>>) attributes {dimension_semantics = [#tpu.dimension_semantics<parallel>, #tpu.dimension_semantics<arbitrary>], iteration_bounds = array<i64: 2, 1>, scalar_prefetch = 0 : i64, scratch_operands = 1 : i64, tpu.core_type = #tpu.core_type<tc>, window_params = [{pipeline_mode = #tpu.pipeline_mode<synchronous>, transform_indices = @transform_0, window_bounds = array<i64: 1, 8, 32>}, {pipeline_mode = #tpu.pipeline_mode<synchronous>, transform_indices = @transform_1, window_bounds = array<i64: 32, 32>}, {pipeline_mode = #tpu.pipeline_mode<synchronous>, transform_indices = @transform_2, window_bounds = array<i64: 64, 32>}, {pipeline_mode = #tpu.pipeline_mode<synchronous>, transform_indices = @transform_3, window_bounds = array<i64: 32, 32>}, {pipeline_mode = #tpu.pipeline_mode<synchronous>, transform_indices = @transform_4, window_bounds = array<i64: 1, 32>}, {transform_indices = @transform_5, window_bounds = array<i64: 1, 8, 32>}]} {
    %c0_i32 = arith.constant 0 : i32
    %0 = arith.cmpi eq, %arg1, %c0_i32 : i32
    %1 = arith.extui %0 : i1 to i32
    %c0_i32_0 = arith.constant 0 : i32
    %2 = arith.cmpi ne, %1, %c0_i32_0 : i32
    scf.if %2 {
      %c0_38 = arith.constant 0 : index
      %c0_39 = arith.constant 0 : index
      %c0_40 = arith.constant 0 : index
      %81 = vector.load %arg2[%c0_38, %c0_39, %c0_40] : memref<1x8x32xf32, #tpu.memory_space<vmem>>, vector<1x8x32xf32>
      %82 = vector.shape_cast %81 : vector<1x8x32xf32> to vector<8x32xf32>
      %c0_41 = arith.constant 0 : index
      %c0_42 = arith.constant 0 : index
      %83 = vector.load %arg4[%c0_41, %c0_42] : memref<64x32xf32, #tpu.memory_space<vmem>>, vector<64x32xf32>
      %cst_43 = arith.constant dense<0.000000e+00> : vector<8x64xf32>
      %84 = tpu.matmul %82, %83, %cst_43 {dimension_numbers = #tpu.dot_dimension_numbers<[1], [1], [0], [0], [0, 0, 1, 0], [], []>} : vector<8x32xf32>, vector<64x32xf32>, vector<8x64xf32> -> vector<8x64xf32>
      %c0_44 = arith.constant 0 : index
      %c0_45 = arith.constant 0 : index
      %85 = vector.load %arg8[%c0_44, %c0_45] : memref<8x64xf32, #tpu.memory_space<vmem>>, vector<8x64xf32>
      tpu.vector_store %arg8[%c0_44, %c0_45], %84 {strides = array<i32>} : memref<8x64xf32, #tpu.memory_space<vmem>>, vector<8x64xf32>,
    } else {
    }
    %c8_i32 = arith.constant 8 : i32
    %3 = arith.muli %arg1, %c8_i32 : i32
    %4 = tpu.assume_multiple %3, 8 : i32
    %c0 = arith.constant 0 : index
    %5 = arith.index_cast %4 : i32 to index
    %c0_1 = arith.constant 0 : index
    %6 = vector.load %arg2[%c0, %5, %c0_1] : memref<1x8x32xf32, #tpu.memory_space<vmem>>, vector<1x8x32xf32>
    %7 = vector.shape_cast %6 : vector<1x8x32xf32> to vector<8x32xf32>
    %c0_2 = arith.constant 0 : index
    %c0_3 = arith.constant 0 : index
    %8 = vector.load %arg3[%c0_2, %c0_3] : memref<32x32xf32, #tpu.memory_space<vmem>>, vector<32x32xf32>
    %cst = arith.constant dense<0.000000e+00> : vector<8x32xf32>
    %9 = tpu.matmul %7, %8, %cst {dimension_numbers = #tpu.dot_dimension_numbers<[1], [1], [0], [0], [0, 0, 1, 0], [], []>} : vector<8x32xf32>, vector<32x32xf32>, vector<8x32xf32> -> vector<8x32xf32>
    %cst_4 = arith.constant 0.353553385 : f32
    %10 = vector.broadcast %cst_4 : f32 to vector<8x32xf32>
    %11 = arith.mulf %9, %10 : vector<8x32xf32>
    %12 = vector.extract_strided_slice %11 {offsets = [0, 0], sizes = [8, 8], strides = [1, 1]} : vector<8x32xf32> to vector<8x8xf32>
    %c0_5 = arith.constant 0 : index
    %c0_6 = arith.constant 0 : index
    %13 = vector.load %arg8[%c0_5, %c0_6] : memref<8x64xf32, #tpu.memory_space<vmem>>, vector<8x8xf32>
    %c0_7 = arith.constant 0 : index
    %c32 = arith.constant 32 : index
    %14 = vector.load %arg8[%c0_7, %c32] : memref<8x64xf32, #tpu.memory_space<vmem>>, vector<8x8xf32>
    %cst_8 = arith.constant dense<0.000000e+00> : vector<8x8xf32>
    %15 = tpu.matmul %12, %13, %cst_8 {dimension_numbers = #tpu.dot_dimension_numbers<[1], [1], [0], [0], [0, 0, 1, 0], [], []>} : vector<8x8xf32>, vector<8x8xf32>, vector<8x8xf32> -> vector<8x8xf32>
    %cst_9 = arith.constant dense<0xFF800000> : vector<8xf32>
    %16 = vector.multi_reduction <maximumf>, %15, %cst_9 [1] : vector<8x8xf32> to vector<8xf32>
    %17 = vector.shape_cast %16 : vector<8xf32> to vector<8x1xf32>
    %18 = vector.broadcast %17 : vector<8x1xf32> to vector<8x8xf32>
    %19 = arith.subf %15, %18 : vector<8x8xf32>
    %20 = math.exp %19 : vector<8x8xf32>
    %cst_10 = arith.constant dense<0.000000e+00> : vector<8xf32>
    %21 = vector.multi_reduction <add>, %20, %cst_10 [1] : vector<8x8xf32> to vector<8xf32>
    %22 = vector.shape_cast %21 : vector<8xf32> to vector<8x1xf32>
    %cst_11 = arith.constant dense<0.000000e+00> : vector<8x8xf32>
    %23 = tpu.matmul %20, %14, %cst_11 {dimension_numbers = #tpu.dot_dimension_numbers<[1], [0], [0], [1], [0, 0, 1, 1], [], []>} : vector<8x8xf32>, vector<8x8xf32>, vector<8x8xf32> -> vector<8x8xf32>
    %24 = tpu.reciprocal %22 {approx = true} : vector<8x1xf32> -> vector<8x1xf32>
    %25 = vector.broadcast %24 : vector<8x1xf32> to vector<8x8xf32>
    %26 = arith.mulf %23, %25 : vector<8x8xf32>
    %27 = vector.extract_strided_slice %11 {offsets = [0, 8], sizes = [8, 8], strides = [1, 1]} : vector<8x32xf32> to vector<8x8xf32>
    %c0_12 = arith.constant 0 : index
    %c8 = arith.constant 8 : index
    %28 = vector.load %arg8[%c0_12, %c8] : memref<8x64xf32, #tpu.memory_space<vmem>>, vector<8x8xf32>
    %c0_13 = arith.constant 0 : index
    %c40 = arith.constant 40 : index
    %29 = vector.load %arg8[%c0_13, %c40] : memref<8x64xf32, #tpu.memory_space<vmem>>, vector<8x8xf32>
    %cst_14 = arith.constant dense<0.000000e+00> : vector<8x8xf32>
    %30 = tpu.matmul %27, %28, %cst_14 {dimension_numbers = #tpu.dot_dimension_numbers<[1], [1], [0], [0], [0, 0, 1, 0], [], []>} : vector<8x8xf32>, vector<8x8xf32>, vector<8x8xf32> -> vector<8x8xf32>
    %cst_15 = arith.constant dense<0xFF800000> : vector<8xf32>
    %31 = vector.multi_reduction <maximumf>, %30, %cst_15 [1] : vector<8x8xf32> to vector<8xf32>
    %32 = vector.shape_cast %31 : vector<8xf32> to vector<8x1xf32>
    %33 = vector.broadcast %32 : vector<8x1xf32> to vector<8x8xf32>
    %34 = arith.subf %30, %33 : vector<8x8xf32>
    %35 = math.exp %34 : vector<8x8xf32>
    %cst_16 = arith.constant dense<0.000000e+00> : vector<8xf32>
    %36 = vector.multi_reduction <add>, %35, %cst_16 [1] : vector<8x8xf32> to vector<8xf32>
    %37 = vector.shape_cast %36 : vector<8xf32> to vector<8x1xf32>
    %cst_17 = arith.constant dense<0.000000e+00> : vector<8x8xf32>
    %38 = tpu.matmul %35, %29, %cst_17 {dimension_numbers = #tpu.dot_dimension_numbers<[1], [0], [0], [1], [0, 0, 1, 1], [], []>} : vector<8x8xf32>, vector<8x8xf32>, vector<8x8xf32> -> vector<8x8xf32>
    %39 = tpu.reciprocal %37 {approx = true} : vector<8x1xf32> -> vector<8x1xf32>
    %40 = vector.broadcast %39 : vector<8x1xf32> to vector<8x8xf32>
    %41 = arith.mulf %38, %40 : vector<8x8xf32>
    %42 = vector.extract_strided_slice %11 {offsets = [0, 16], sizes = [8, 8], strides = [1, 1]} : vector<8x32xf32> to vector<8x8xf32>
    %c0_18 = arith.constant 0 : index
    %c16 = arith.constant 16 : index
    %43 = vector.load %arg8[%c0_18, %c16] : memref<8x64xf32, #tpu.memory_space<vmem>>, vector<8x8xf32>
    %c0_19 = arith.constant 0 : index
    %c48 = arith.constant 48 : index
    %44 = vector.load %arg8[%c0_19, %c48] : memref<8x64xf32, #tpu.memory_space<vmem>>, vector<8x8xf32>
    %cst_20 = arith.constant dense<0.000000e+00> : vector<8x8xf32>
    %45 = tpu.matmul %42, %43, %cst_20 {dimension_numbers = #tpu.dot_dimension_numbers<[1], [1], [0], [0], [0, 0, 1, 0], [], []>} : vector<8x8xf32>, vector<8x8xf32>, vector<8x8xf32> -> vector<8x8xf32>
    %cst_21 = arith.constant dense<0xFF800000> : vector<8xf32>
    %46 = vector.multi_reduction <maximumf>, %45, %cst_21 [1] : vector<8x8xf32> to vector<8xf32>
    %47 = vector.shape_cast %46 : vector<8xf32> to vector<8x1xf32>
    %48 = vector.broadcast %47 : vector<8x1xf32> to vector<8x8xf32>
    %49 = arith.subf %45, %48 : vector<8x8xf32>
    %50 = math.exp %49 : vector<8x8xf32>
    %cst_22 = arith.constant dense<0.000000e+00> : vector<8xf32>
    %51 = vector.multi_reduction <add>, %50, %cst_22 [1] : vector<8x8xf32> to vector<8xf32>
    %52 = vector.shape_cast %51 : vector<8xf32> to vector<8x1xf32>
    %cst_23 = arith.constant dense<0.000000e+00> : vector<8x8xf32>
    %53 = tpu.matmul %50, %44, %cst_23 {dimension_numbers = #tpu.dot_dimension_numbers<[1], [0], [0], [1], [0, 0, 1, 1], [], []>} : vector<8x8xf32>, vector<8x8xf32>, vector<8x8xf32> -> vector<8x8xf32>
    %54 = tpu.reciprocal %52 {approx = true} : vector<8x1xf32> -> vector<8x1xf32>
    %55 = vector.broadcast %54 : vector<8x1xf32> to vector<8x8xf32>
    %56 = arith.mulf %53, %55 : vector<8x8xf32>
    %57 = vector.extract_strided_slice %11 {offsets = [0, 24], sizes = [8, 8], strides = [1, 1]} : vector<8x32xf32> to vector<8x8xf32>
    %c0_24 = arith.constant 0 : index
    %c24 = arith.constant 24 : index
    %58 = vector.load %arg8[%c0_24, %c24] : memref<8x64xf32, #tpu.memory_space<vmem>>, vector<8x8xf32>
    %c0_25 = arith.constant 0 : index
    %c56 = arith.constant 56 : index
    %59 = vector.load %arg8[%c0_25, %c56] : memref<8x64xf32, #tpu.memory_space<vmem>>, vector<8x8xf32>
    %cst_26 = arith.constant dense<0.000000e+00> : vector<8x8xf32>
    %60 = tpu.matmul %57, %58, %cst_26 {dimension_numbers = #tpu.dot_dimension_numbers<[1], [1], [0], [0], [0, 0, 1, 0], [], []>} : vector<8x8xf32>, vector<8x8xf32>, vector<8x8xf32> -> vector<8x8xf32>
    %cst_27 = arith.constant dense<0xFF800000> : vector<8xf32>
    %61 = vector.multi_reduction <maximumf>, %60, %cst_27 [1] : vector<8x8xf32> to vector<8xf32>
    %62 = vector.shape_cast %61 : vector<8xf32> to vector<8x1xf32>
    %63 = vector.broadcast %62 : vector<8x1xf32> to vector<8x8xf32>
    %64 = arith.subf %60, %63 : vector<8x8xf32>
    %65 = math.exp %64 : vector<8x8xf32>
    %cst_28 = arith.constant dense<0.000000e+00> : vector<8xf32>
    %66 = vector.multi_reduction <add>, %65, %cst_28 [1] : vector<8x8xf32> to vector<8xf32>
    %67 = vector.shape_cast %66 : vector<8xf32> to vector<8x1xf32>
    %cst_29 = arith.constant dense<0.000000e+00> : vector<8x8xf32>
    %68 = tpu.matmul %65, %59, %cst_29 {dimension_numbers = #tpu.dot_dimension_numbers<[1], [0], [0], [1], [0, 0, 1, 1], [], []>} : vector<8x8xf32>, vector<8x8xf32>, vector<8x8xf32> -> vector<8x8xf32>
    %69 = tpu.reciprocal %67 {approx = true} : vector<8x1xf32> -> vector<8x1xf32>
    %70 = vector.broadcast %69 : vector<8x1xf32> to vector<8x8xf32>
    %71 = arith.mulf %68, %70 : vector<8x8xf32>
    %72 = tpu.concatenate %26, %41, %56, %71 in 1 : vector<8x8xf32>, vector<8x8xf32>, vector<8x8xf32>, vector<8x8xf32> -> vector<8x32xf32>
    %c0_30 = arith.constant 0 : index
    %c0_31 = arith.constant 0 : index
    %73 = vector.load %arg5[%c0_30, %c0_31] : memref<32x32xf32, #tpu.memory_space<vmem>>, vector<32x32xf32>
    %cst_32 = arith.constant dense<0.000000e+00> : vector<8x32xf32>
    %74 = tpu.matmul %72, %73, %cst_32 {dimension_numbers = #tpu.dot_dimension_numbers<[1], [1], [0], [0], [0, 0, 1, 0], [], []>} : vector<8x32xf32>, vector<32x32xf32>, vector<8x32xf32> -> vector<8x32xf32>
    %c0_33 = arith.constant 0 : index
    %c0_34 = arith.constant 0 : index
    %75 = vector.load %arg6[%c0_33, %c0_34] : memref<1x32xf32, #tpu.memory_space<vmem>>, vector<1x32xf32>
    %76 = vector.broadcast %75 : vector<1x32xf32> to vector<8x32xf32>
    %77 = arith.addf %74, %76 : vector<8x32xf32>
    %c0_35 = arith.constant 0 : index
    %c0_36 = arith.constant 0 : index
    %c0_37 = arith.constant 0 : index
    %78 = vector.load %arg7[%c0_35, %c0_36, %c0_37] : memref<1x8x32xf32, #tpu.memory_space<vmem>>, vector<1x8x32xf32>
    %79 = vector.shape_cast %78 : vector<1x8x32xf32> to vector<8x32xf32>
    %80 = vector.shape_cast %77 : vector<8x32xf32> to vector<1x8x32xf32>
    tpu.vector_store %arg7[%c0_35, %c0_36, %c0_37], %80 {strides = array<i32>} : memref<1x8x32xf32, #tpu.memory_space<vmem>>, vector<1x8x32xf32>,
    return
  }
  func.func @transform_0(%arg0: i32, %arg1: i32) -> (i32, i32, i32) {
    %c0_i32 = arith.constant 0 : i32
    %c0_i32_0 = arith.constant 0 : i32
    %c0_i32_1 = arith.constant 0 : i32
    return %arg0, %c0_i32, %c0_i32_0 : i32, i32, i32
  }
  func.func @transform_1(%arg0: i32, %arg1: i32) -> (i32, i32) {
    %c0_i32 = arith.constant 0 : i32
    %c0_i32_0 = arith.constant 0 : i32
    %c0_i32_1 = arith.constant 0 : i32
    return %c0_i32, %c0_i32_0 : i32, i32
  }
  func.func @transform_2(%arg0: i32, %arg1: i32) -> (i32, i32) {
    %c0_i32 = arith.constant 0 : i32
    %c0_i32_0 = arith.constant 0 : i32
    %c0_i32_1 = arith.constant 0 : i32
    return %c0_i32, %c0_i32_0 : i32, i32
  }
  func.func @transform_3(%arg0: i32, %arg1: i32) -> (i32, i32) {
    %c0_i32 = arith.constant 0 : i32
    %c0_i32_0 = arith.constant 0 : i32
    %c0_i32_1 = arith.constant 0 : i32
    return %c0_i32, %c0_i32_0 : i32, i32
  }
  func.func @transform_4(%arg0: i32, %arg1: i32) -> (i32, i32) {
    %c0_i32 = arith.constant 0 : i32
    %c0_i32_0 = arith.constant 0 : i32
    %c0_i32_1 = arith.constant 0 : i32
    return %c0_i32, %c0_i32_0 : i32, i32
  }
  func.func @transform_5(%arg0: i32, %arg1: i32) -> (i32, i32, i32) {
    %c0_i32 = arith.constant 0 : i32
    %c0_i32_0 = arith.constant 0 : i32
    return %arg0, %arg1, %c0_i32 : i32, i32, i32
  }
}

module attributes {stable_mosaic.version = 11 : i64} {
  func.func @_attention_kernel(%arg0: i32, %arg1: i32, %arg2: memref<1x8x32xf32, #tpu.memory_space<vmem>>, %arg3: memref<32x32xf32, #tpu.memory_space<vmem>>, %arg4: memref<64x32xf32, #tpu.memory_space<vmem>>, %arg5: memref<32x32xf32, #tpu.memory_space<vmem>>, %arg6: memref<1x32xf32, #tpu.memory_space<vmem>>, %arg7: memref<1x8x32xf32, #tpu.memory_space<vmem>>, %arg8: memref<8x64xf32, #tpu.memory_space<vmem>>) attributes {dimension_semantics = [#tpu.dimension_semantics<parallel>, #tpu.dimension_semantics<arbitrary>], iteration_bounds = array<i64: 2, 1>, scalar_prefetch = 0 : i64, scratch_operands = 1 : i64, tpu.core_type = #tpu.core_type<tc>, window_params = [{transform_indices = @transform_0, window_bounds = array<i64: 1, 8, 32>}, {pipeline_mode = #tpu.pipeline_mode<synchronous>, transform_indices = @transform_1, window_bounds = array<i64: 32, 32>}, {pipeline_mode = #tpu.pipeline_mode<synchronous>, transform_indices = @transform_2, window_bounds = array<i64: 64, 32>}, {pipeline_mode = #tpu.pipeline_mode<synchronous>, transform_indices = @transform_3, window_bounds = array<i64: 32, 32>}, {pipeline_mode = #tpu.pipeline_mode<synchronous>, transform_indices = @transform_4, window_bounds = array<i64: 1, 32>}, {transform_indices = @transform_5, window_bounds = array<i64: 1, 8, 32>}]} {
    %c0_i32 = arith.constant 0 : i32
    %0 = arith.cmpi eq, %arg1, %c0_i32 : i32
    %1 = arith.extui %0 : i1 to i32
    %c0_i32_0 = arith.constant 0 : i32
    %2 = arith.cmpi ne, %1, %c0_i32_0 : i32
    scf.if %2 {
      %c0_38 = arith.constant 0 : index
      %c0_39 = arith.constant 0 : index
      %c0_40 = arith.constant 0 : index
      %81 = vector.load %arg2[%c0_38, %c0_39, %c0_40] : memref<1x8x32xf32, #tpu.memory_space<vmem>>, vector<1x8x32xf32>
      %82 = vector.shape_cast %81 : vector<1x8x32xf32> to vector<8x32xf32>
      %c0_41 = arith.constant 0 : index
      %c0_42 = arith.constant 0 : index
      %83 = vector.load %arg4[%c0_41, %c0_42] : memref<64x32xf32, #tpu.memory_space<vmem>>, vector<64x32xf32>
      %cst_43 = arith.constant dense<0.000000e+00> : vector<8x64xf32>
      %84 = tpu.matmul %82, %83, %cst_43 {dimension_numbers = #tpu.dot_dimension_numbers<[1], [1], [0], [0], [0, 0, 1, 0], [], []>} : vector<8x32xf32>, vector<64x32xf32>, vector<8x64xf32> -> vector<8x64xf32>
      %c0_44 = arith.constant 0 : index
      %c0_45 = arith.constant 0 : index
      %85 = vector.load %arg8[%c0_44, %c0_45] : memref<8x64xf32, #tpu.memory_space<vmem>>, vector<8x64xf32>
      tpu.vector_store %arg8[%c0_44, %c0_45], %84 {strides = array<i32>} : memref<8x64xf32, #tpu.memory_space<vmem>>, vector<8x64xf32>,
    } else {
    }
    %c8_i32 = arith.constant 8 : i32
    %3 = arith.muli %arg1, %c8_i32 : i32
    %4 = tpu.assume_multiple %3, 8 : i32
    %c0 = arith.constant 0 : index
    %5 = arith.index_cast %4 : i32 to index
    %c0_1 = arith.constant 0 : index
    %6 = vector.load %arg2[%c0, %5, %c0_1] : memref<1x8x32xf32, #tpu.memory_space<vmem>>, vector<1x8x32xf32>
    %7 = vector.shape_cast %6 : vector<1x8x32xf32> to vector<8x32xf32>
    %c0_2 = arith.constant 0 : index
    %c0_3 = arith.constant 0 : index
    %8 = vector.load %arg3[%c0_2, %c0_3] : memref<32x32xf32, #tpu.memory_space<vmem>>, vector<32x32xf32>
    %cst = arith.constant dense<0.000000e+00> : vector<8x32xf32>
    %9 = tpu.matmul %7, %8, %cst {dimension_numbers = #tpu.dot_dimension_numbers<[1], [1], [0], [0], [0, 0, 1, 0], [], []>} : vector<8x32xf32>, vector<32x32xf32>, vector<8x32xf32> -> vector<8x32xf32>
    %cst_4 = arith.constant 0.353553385 : f32
    %10 = vector.broadcast %cst_4 : f32 to vector<8x32xf32>
    %11 = arith.mulf %9, %10 : vector<8x32xf32>
    %12 = vector.extract_strided_slice %11 {offsets = [0, 0], sizes = [8, 8], strides = [1, 1]} : vector<8x32xf32> to vector<8x8xf32>
    %c0_5 = arith.constant 0 : index
    %c0_6 = arith.constant 0 : index
    %13 = vector.load %arg8[%c0_5, %c0_6] : memref<8x64xf32, #tpu.memory_space<vmem>>, vector<8x8xf32>
    %c0_7 = arith.constant 0 : index
    %c32 = arith.constant 32 : index
    %14 = vector.load %arg8[%c0_7, %c32] : memref<8x64xf32, #tpu.memory_space<vmem>>, vector<8x8xf32>
    %cst_8 = arith.constant dense<0.000000e+00> : vector<8x8xf32>
    %15 = tpu.matmul %12, %13, %cst_8 {dimension_numbers = #tpu.dot_dimension_numbers<[1], [1], [0], [0], [0, 0, 1, 0], [], []>} : vector<8x8xf32>, vector<8x8xf32>, vector<8x8xf32> -> vector<8x8xf32>
    %cst_9 = arith.constant dense<0xFF800000> : vector<8xf32>
    %16 = vector.multi_reduction <maximumf>, %15, %cst_9 [1] : vector<8x8xf32> to vector<8xf32>
    %17 = vector.shape_cast %16 : vector<8xf32> to vector<8x1xf32>
    %18 = vector.broadcast %17 : vector<8x1xf32> to vector<8x8xf32>
    %19 = arith.subf %15, %18 : vector<8x8xf32>
    %20 = math.exp %19 : vector<8x8xf32>
    %cst_10 = arith.constant dense<0.000000e+00> : vector<8xf32>
    %21 = vector.multi_reduction <add>, %20, %cst_10 [1] : vector<8x8xf32> to vector<8xf32>
    %22 = vector.shape_cast %21 : vector<8xf32> to vector<8x1xf32>
    %cst_11 = arith.constant dense<0.000000e+00> : vector<8x8xf32>
    %23 = tpu.matmul %20, %14, %cst_11 {dimension_numbers = #tpu.dot_dimension_numbers<[1], [0], [0], [1], [0, 0, 1, 1], [], []>} : vector<8x8xf32>, vector<8x8xf32>, vector<8x8xf32> -> vector<8x8xf32>
    %24 = tpu.reciprocal %22 {approx = true} : vector<8x1xf32> -> vector<8x1xf32>
    %25 = vector.broadcast %24 : vector<8x1xf32> to vector<8x8xf32>
    %26 = arith.mulf %23, %25 : vector<8x8xf32>
    %27 = vector.extract_strided_slice %11 {offsets = [0, 8], sizes = [8, 8], strides = [1, 1]} : vector<8x32xf32> to vector<8x8xf32>
    %c0_12 = arith.constant 0 : index
    %c8 = arith.constant 8 : index
    %28 = vector.load %arg8[%c0_12, %c8] : memref<8x64xf32, #tpu.memory_space<vmem>>, vector<8x8xf32>
    %c0_13 = arith.constant 0 : index
    %c40 = arith.constant 40 : index
    %29 = vector.load %arg8[%c0_13, %c40] : memref<8x64xf32, #tpu.memory_space<vmem>>, vector<8x8xf32>
    %cst_14 = arith.constant dense<0.000000e+00> : vector<8x8xf32>
    %30 = tpu.matmul %27, %28, %cst_14 {dimension_numbers = #tpu.dot_dimension_numbers<[1], [1], [0], [0], [0, 0, 1, 0], [], []>} : vector<8x8xf32>, vector<8x8xf32>, vector<8x8xf32> -> vector<8x8xf32>
    %cst_15 = arith.constant dense<0xFF800000> : vector<8xf32>
    %31 = vector.multi_reduction <maximumf>, %30, %cst_15 [1] : vector<8x8xf32> to vector<8xf32>
    %32 = vector.shape_cast %31 : vector<8xf32> to vector<8x1xf32>
    %33 = vector.broadcast %32 : vector<8x1xf32> to vector<8x8xf32>
    %34 = arith.subf %30, %33 : vector<8x8xf32>
    %35 = math.exp %34 : vector<8x8xf32>
    %cst_16 = arith.constant dense<0.000000e+00> : vector<8xf32>
    %36 = vector.multi_reduction <add>, %35, %cst_16 [1] : vector<8x8xf32> to vector<8xf32>
    %37 = vector.shape_cast %36 : vector<8xf32> to vector<8x1xf32>
    %cst_17 = arith.constant dense<0.000000e+00> : vector<8x8xf32>
    %38 = tpu.matmul %35, %29, %cst_17 {dimension_numbers = #tpu.dot_dimension_numbers<[1], [0], [0], [1], [0, 0, 1, 1], [], []>} : vector<8x8xf32>, vector<8x8xf32>, vector<8x8xf32> -> vector<8x8xf32>
    %39 = tpu.reciprocal %37 {approx = true} : vector<8x1xf32> -> vector<8x1xf32>
    %40 = vector.broadcast %39 : vector<8x1xf32> to vector<8x8xf32>
    %41 = arith.mulf %38, %40 : vector<8x8xf32>
    %42 = vector.extract_strided_slice %11 {offsets = [0, 16], sizes = [8, 8], strides = [1, 1]} : vector<8x32xf32> to vector<8x8xf32>
    %c0_18 = arith.constant 0 : index
    %c16 = arith.constant 16 : index
    %43 = vector.load %arg8[%c0_18, %c16] : memref<8x64xf32, #tpu.memory_space<vmem>>, vector<8x8xf32>
    %c0_19 = arith.constant 0 : index
    %c48 = arith.constant 48 : index
    %44 = vector.load %arg8[%c0_19, %c48] : memref<8x64xf32, #tpu.memory_space<vmem>>, vector<8x8xf32>
    %cst_20 = arith.constant dense<0.000000e+00> : vector<8x8xf32>
    %45 = tpu.matmul %42, %43, %cst_20 {dimension_numbers = #tpu.dot_dimension_numbers<[1], [1], [0], [0], [0, 0, 1, 0], [], []>} : vector<8x8xf32>, vector<8x8xf32>, vector<8x8xf32> -> vector<8x8xf32>
    %cst_21 = arith.constant dense<0xFF800000> : vector<8xf32>
    %46 = vector.multi_reduction <maximumf>, %45, %cst_21 [1] : vector<8x8xf32> to vector<8xf32>
    %47 = vector.shape_cast %46 : vector<8xf32> to vector<8x1xf32>
    %48 = vector.broadcast %47 : vector<8x1xf32> to vector<8x8xf32>
    %49 = arith.subf %45, %48 : vector<8x8xf32>
    %50 = math.exp %49 : vector<8x8xf32>
    %cst_22 = arith.constant dense<0.000000e+00> : vector<8xf32>
    %51 = vector.multi_reduction <add>, %50, %cst_22 [1] : vector<8x8xf32> to vector<8xf32>
    %52 = vector.shape_cast %51 : vector<8xf32> to vector<8x1xf32>
    %cst_23 = arith.constant dense<0.000000e+00> : vector<8x8xf32>
    %53 = tpu.matmul %50, %44, %cst_23 {dimension_numbers = #tpu.dot_dimension_numbers<[1], [0], [0], [1], [0, 0, 1, 1], [], []>} : vector<8x8xf32>, vector<8x8xf32>, vector<8x8xf32> -> vector<8x8xf32>
    %54 = tpu.reciprocal %52 {approx = true} : vector<8x1xf32> -> vector<8x1xf32>
    %55 = vector.broadcast %54 : vector<8x1xf32> to vector<8x8xf32>
    %56 = arith.mulf %53, %55 : vector<8x8xf32>
    %57 = vector.extract_strided_slice %11 {offsets = [0, 24], sizes = [8, 8], strides = [1, 1]} : vector<8x32xf32> to vector<8x8xf32>
    %c0_24 = arith.constant 0 : index
    %c24 = arith.constant 24 : index
    %58 = vector.load %arg8[%c0_24, %c24] : memref<8x64xf32, #tpu.memory_space<vmem>>, vector<8x8xf32>
    %c0_25 = arith.constant 0 : index
    %c56 = arith.constant 56 : index
    %59 = vector.load %arg8[%c0_25, %c56] : memref<8x64xf32, #tpu.memory_space<vmem>>, vector<8x8xf32>
    %cst_26 = arith.constant dense<0.000000e+00> : vector<8x8xf32>
    %60 = tpu.matmul %57, %58, %cst_26 {dimension_numbers = #tpu.dot_dimension_numbers<[1], [1], [0], [0], [0, 0, 1, 0], [], []>} : vector<8x8xf32>, vector<8x8xf32>, vector<8x8xf32> -> vector<8x8xf32>
    %cst_27 = arith.constant dense<0xFF800000> : vector<8xf32>
    %61 = vector.multi_reduction <maximumf>, %60, %cst_27 [1] : vector<8x8xf32> to vector<8xf32>
    %62 = vector.shape_cast %61 : vector<8xf32> to vector<8x1xf32>
    %63 = vector.broadcast %62 : vector<8x1xf32> to vector<8x8xf32>
    %64 = arith.subf %60, %63 : vector<8x8xf32>
    %65 = math.exp %64 : vector<8x8xf32>
    %cst_28 = arith.constant dense<0.000000e+00> : vector<8xf32>
    %66 = vector.multi_reduction <add>, %65, %cst_28 [1] : vector<8x8xf32> to vector<8xf32>
    %67 = vector.shape_cast %66 : vector<8xf32> to vector<8x1xf32>
    %cst_29 = arith.constant dense<0.000000e+00> : vector<8x8xf32>
    %68 = tpu.matmul %65, %59, %cst_29 {dimension_numbers = #tpu.dot_dimension_numbers<[1], [0], [0], [1], [0, 0, 1, 1], [], []>} : vector<8x8xf32>, vector<8x8xf32>, vector<8x8xf32> -> vector<8x8xf32>
    %69 = tpu.reciprocal %67 {approx = true} : vector<8x1xf32> -> vector<8x1xf32>
    %70 = vector.broadcast %69 : vector<8x1xf32> to vector<8x8xf32>
    %71 = arith.mulf %68, %70 : vector<8x8xf32>
    %72 = tpu.concatenate %26, %41, %56, %71 in 1 : vector<8x8xf32>, vector<8x8xf32>, vector<8x8xf32>, vector<8x8xf32> -> vector<8x32xf32>
    %c0_30 = arith.constant 0 : index
    %c0_31 = arith.constant 0 : index
    %73 = vector.load %arg5[%c0_30, %c0_31] : memref<32x32xf32, #tpu.memory_space<vmem>>, vector<32x32xf32>
    %cst_32 = arith.constant dense<0.000000e+00> : vector<8x32xf32>
    %74 = tpu.matmul %72, %73, %cst_32 {dimension_numbers = #tpu.dot_dimension_numbers<[1], [1], [0], [0], [0, 0, 1, 0], [], []>} : vector<8x32xf32>, vector<32x32xf32>, vector<8x32xf32> -> vector<8x32xf32>
    %c0_33 = arith.constant 0 : index
    %c0_34 = arith.constant 0 : index
    %75 = vector.load %arg6[%c0_33, %c0_34] : memref<1x32xf32, #tpu.memory_space<vmem>>, vector<1x32xf32>
    %76 = vector.broadcast %75 : vector<1x32xf32> to vector<8x32xf32>
    %77 = arith.addf %74, %76 : vector<8x32xf32>
    %c0_35 = arith.constant 0 : index
    %c0_36 = arith.constant 0 : index
    %c0_37 = arith.constant 0 : index
    %78 = vector.load %arg7[%c0_35, %c0_36, %c0_37] : memref<1x8x32xf32, #tpu.memory_space<vmem>>, vector<1x8x32xf32>
    %79 = vector.shape_cast %78 : vector<1x8x32xf32> to vector<8x32xf32>
    %80 = vector.shape_cast %77 : vector<8x32xf32> to vector<1x8x32xf32>
    tpu.vector_store %arg7[%c0_35, %c0_36, %c0_37], %80 {strides = array<i32>} : memref<1x8x32xf32, #tpu.memory_space<vmem>>, vector<1x8x32xf32>,
    return
  }
  func.func @transform_0(%arg0: i32, %arg1: i32) -> (i32, i32, i32) {
    %c0_i32 = arith.constant 0 : i32
    %c0_i32_0 = arith.constant 0 : i32
    %c0_i32_1 = arith.constant 0 : i32
    return %arg0, %c0_i32, %c0_i32_0 : i32, i32, i32
  }
  func.func @transform_1(%arg0: i32, %arg1: i32) -> (i32, i32) {
    %c0_i32 = arith.constant 0 : i32
    %c0_i32_0 = arith.constant 0 : i32
    %c0_i32_1 = arith.constant 0 : i32
    return %c0_i32, %c0_i32_0 : i32, i32
  }
  func.func @transform_2(%arg0: i32, %arg1: i32) -> (i32, i32) {
    %c0_i32 = arith.constant 0 : i32
    %c0_i32_0 = arith.constant 0 : i32
    %c0_i32_1 = arith.constant 0 : i32
    return %c0_i32, %c0_i32_0 : i32, i32
  }
  func.func @transform_3(%arg0: i32, %arg1: i32) -> (i32, i32) {
    %c0_i32 = arith.constant 0 : i32
    %c0_i32_0 = arith.constant 0 : i32
    %c0_i32_1 = arith.constant 0 : i32
    return %c0_i32, %c0_i32_0 : i32, i32
  }
  func.func @transform_4(%arg0: i32, %arg1: i32) -> (i32, i32) {
    %c0_i32 = arith.constant 0 : i32
    %c0_i32_0 = arith.constant 0 : i32
    %c0_i32_1 = arith.constant 0 : i32
    return %c0_i32, %c0_i32_0 : i32, i32
  }
  func.func @transform_5(%arg0: i32, %arg1: i32) -> (i32, i32, i32) {
    %c0_i32 = arith.constant 0 : i32
    %c0_i32_0 = arith.constant 0 : i32
    return %arg0, %arg1, %c0_i32 : i32, i32, i32
  }
}

</mosaic_0001>

<bundles_post_ra>
// kernel: tpu_custom_call.1
= control target key start
LH: loop header
LB: loop body
LE: loop exit
PB: predicated region body
PF: predicated region fallthrough
CT: control target
= control target key end

     0   :  { %10 = vsyncpa [#allocation4], 0  ;;  %s1956_s0 = inlined_call_operand.vmem [shape: f32[2,8,32], index: 0, kind: input, shape index: {}]   ;;  %s1957_s1 = inlined_call_operand.vmem [shape: f32[32,32], index: 1, kind: input, shape index: {}]   ;;  %s1958_s2 = inlined_call_operand.vmem [shape: f32[64,32], index: 2, kind: input, shape index: {}]   ;;  %s1959_s3 = inlined_call_operand.vmem [shape: f32[32,32], index: 3, kind: input, shape index: {}]   ;;  %s1960_s4 = inlined_call_operand.vmem [shape: f32[1,32], index: 4, kind: input, shape index: {}]   ;;  %s1961_s5 = inlined_call_operand.hbm [shape: f32[2,8,32], index: 5, kind: output, shape index: {}]  }
   0x1   :  { %12 = vsyncpa [#allocation4 + $0x1], 0  ;;  %s1701_s18 = smov 0   ;;  %s1703_s19 = smov 0  }
   0x2   :  { %s1705_s20 = smov 0   ;;  %s1707_s21 = smov 0  }
   0x3   :  { %s1709_s22 = smov 0   ;;  %s1711_s23 = smov 0  }
   0x4 LB: > { %s1303_s24 = sadd.s32 4294967295, %s1655_s23   ;;  %s1304_s25 = sadd.s32 4294967294, %s1655_s23   ;;  %s1655_s23 = sphi %s1711_s23, %s18_s23   ;;  %s1651_s22 = sphi %s1709_s22, %s1970_s22   ;;  %s1647_s21 = sphi %s1707_s21, %s1969_s21   ;;  %s1643_s20 = sphi %s1705_s20, %s1968_s20   ;;  %s1639_s19 = sphi %s1703_s19, %s1967_s19   ;;  %s1635_s18 = sphi %s1701_s18, %s1966_s18  }
   0x5   : > { %s30_s26 = sadd.s32 1, %s1651_s22  ;;  %s149_s27 = sadd.s32 1, %s1643_s20 }
   0x6   : > { %p32_p0 = scmp.ge.s32.totalorder %s30_s26, 2  ;;  %p159_p1 = scmp.ne.s32.totalorder %s1643_s20, %s1639_s19 }
   0x7   : > { %p160_p2 = scmp.eq.s32.totalorder %s1303_s24, 1  ;;  %p165_p3 = scmp.ne.s32.totalorder %s1639_s19, %s1635_s18 }
   0x8   : > { %s1972_s26 = smov (%p32_p0, %s30_s26), 0  ;;  %p166_p5 = scmp.eq.s32.totalorder %s1304_s25, 1 }
   0x9   : > { %p1741_p4 = por %p160_p2, %p159_p1  ;;  %s144_s29 = ssub.s32 %s1651_s22, %s1972_s26 }
   0xa   : > { %p1306_p6 = scmp.ge.s32.totalorder %s1655_s23, 1  ;;  %p147_p7 = scmp.eq.s32.totalorder %s144_s29, 0 }
   0xb   : > { %p1748_p8 = por %p166_p5, %p165_p3  ;;  %p203_p9 = scmp.lt.s32.totalorder %s1655_s23, 3 }
   0xc   : > { %s1754_s6 = scalar_select %p147_p7, %s1643_s20, %s149_s27  }
   0xd   : > { %p204_p10 = pnand %p1306_p6, %p203_p9 }
   0xe   : > { %v239_v0 = vld [vmem:[%s1958_s2] sm:$0xff] (!%p204_p10)  ;;  %v240_v1 = vld [vmem:[%s1958_s2 + $0x8] sm:$0xff] (!%p204_p10)  ;;  %vm247_vm0 = vcmask (!%p204_p10), 261120   ;;  %v1657_v2 = vmov (!%p204_p10), 0.0|0.0   ;;  %vm1658_vm2 = vmmov (!%p204_p10), 0   ;;  %v1659_v5 = vmov (!%p204_p10), 0.0  }
   0xf   : > { %207 = sbr.rel (%p204_p10) target bundleno = 2321 (0x911), region = 40  ;;  %1461 = vmatprep.subr.bf16.mxu0 (!%p204_p10), %v1657_v2  ;;  %v1462_v3 = vpack.c.bf16 (!%p204_p10), %v240_v1, %v239_v0  ;;  %vm1765_vm1 = vmpackc.low (!%p204_p10), %vm247_vm0, %vm247_vm0  ;;  %1477 = vmatprep.subr.bf16.mxu1 (!%p204_p10), %v1657_v2  ;;  %v350_v6 = vld [vmem:[%s1957_s1] sm:$0xff] (!%p204_p10)  ;;  %v351_v7 = vld [vmem:[%s1957_s1 + $0x8] sm:$0xff] (!%p204_p10)  ;;  %p230_p11 = scmp.lt.s32.totalorder (!%p204_p10), %s1647_s21, 1  ;;  %vm345_vm3 = vcmask (!%p204_p10), 523264   ;;  %vm442_vm4 = vcmask (!%p204_p10), 64512  }
  0x10   : > { %1396 = vmatprep.mubr.msk.f32.mxu0 (!%p204_p10), %vm1658_vm2, %v1659_v5  ;;  %1407 = vmatprep.mubr.msk.f32.mxu1 (!%p204_p10), %vm1658_vm2, %v1659_v5  ;;  %v241_v8 = vld [vmem:[%s1958_s2 + $0x10] sm:$0xff] (!%p204_p10)  ;;  %v242_v9 = vld [vmem:[%s1958_s2 + $0x18] sm:$0xff] (!%p204_p10)  ;;  %v1478_v10 = vpack.c.bf16 (!%p204_p10), %v351_v7, %v350_v6  ;;  %v243_v15 = vld [vmem:[%s1958_s2 + $0x20] sm:$0xff] (!%p204_p10)  ;;  %s1660_s29 = smov (!%p204_p10), 120   ;;  %s1661_s7 = smov (!%p204_p10), 96   ;;  %vm1114_vm5 = vcmask (!%p204_p10), 130048  }
  0x11   : > { %1464 = vmatpush3.bf16.xpose.msk.msra.mxu0 (!%p204_p10), %vm1765_vm1, %v1462_v3  ;;  %v1466_v11 = vpack.c.bf16 (!%p204_p10), %v242_v9, %v241_v8  ;;  %v352_v12 = vld [vmem:[%s1957_s1 + $0x10] sm:$0xff] (!%p204_p10)  ;;  %v353_v13 = vld [vmem:[%s1957_s1 + $0x18] sm:$0xff] (!%p204_p10)  ;;  %v244_v16 = vld [vmem:[%s1958_s2 + $0x28] sm:$0xff] (!%p204_p10)  ;;  %s1663_s9 = smov (!%p204_p10), 112   ;;  %s1664_s10 = smov (!%p204_p10), 80   ;;  %vm1116_vm6 = vcmask (!%p204_p10), 195584  }
  0x12   : > { %1465 = vmatprep.subr.bf16.mxu0 (!%p204_p10), %v1657_v2  ;;  %1480 = vmatpush3.bf16.xpose.msk.msra.mxu1 (!%p204_p10), %vm1765_vm1, %v1478_v10  ;;  %v1482_v14 = vpack.c.bf16 (!%p204_p10), %v353_v13, %v352_v12  ;;  %v1470_v17 = vpack.c.bf16 (!%p204_p10), %v244_v16, %v243_v15  ;;  %v245_v18 = vld [vmem:[%s1958_s2 + $0x30] sm:$0xff] (!%p204_p10)  ;;  %v246_v19 = vld [vmem:[%s1958_s2 + $0x38] sm:$0xff] (!%p204_p10)  ;;  %s1665_s11 = smov (!%p204_p10), 104   ;;  %s1666_s12 = smov (!%p204_p10), 72  }
  0x13   : > { %1481 = vmatprep.subr.bf16.mxu1 (!%p204_p10), %v1657_v2  ;;  %v1474_v21 = vpack.c.bf16 (!%p204_p10), %v246_v19, %v245_v18  ;;  %s1668_s14 = smov (!%p204_p10), 16  }
  0x16   : > { %s231_s8 = scalar_select %p230_p11, %s1647_s21, 1 }
  0x18   : > { %s1308_s13 = sshll.u32 %s231_s8, 3  ;;  %s1662_s8 = smov 88  }
  0x19   : > { %1468 = vmatpush3.bf16.xpose.msk.msra.mxu0 %vm1765_vm1, %v1466_v11  ;;  %s233_s16 = scalar_lea.vmem %s1956_s0, %s1308_s13  ;;  %s1667_s13 = smov 8  }
  0x1a   : > { %1469 = vmatprep.subr.bf16.mxu0 %v1657_v2  ;;  %1484 = vmatpush3.bf16.xpose.msk.msra.mxu1 %vm1765_vm1, %v1482_v14  ;;  %v238_v20 = vld [vmem:[%s233_s16] sm:$0xff] }
  0x1b   : > { %1410 = vmatprep.subr.mxu1 %v1659_v5 }
  0x21   : > { %1472 = vmatpush3.bf16.xpose.msk.msra.mxu0 %vm1765_vm1, %v1470_v17  ;;  %1408 = vmatmul.mubr.msk.f32.vlgmr.msra.gmra.mrb[0].mxu1 %vm247_vm0, %v238_v20 }
  0x22   : > { %1473 = vmatprep.subr.bf16.mxu0 %v1657_v2  ;;  %1412 = vmatprep.mubr.msk.f32.mxu1 %vm1658_vm2, %v1659_v5 }
  0x29   : > { %1476 = vmatpush3.bf16.xpose.msk.msra.mxu0 %vm1765_vm1, %v1474_v21  ;;  %v1119_v21 = vld [vmem:[%s1959_s3 + $0x8] sm:$0xff] }
  0x2a   : > { %1485 = vmatprep.subr.bf16.mxu0 %v1657_v2 }
  0x30   : > { %1397 = vmatmul.mubr.msk.f32.vlgmr.msra.gmra.mrb[0].mxu0 %vm247_vm0, %v238_v20  ;;  %v1118_v20 = vld [vmem:[%s1959_s3] sm:$0xff] }
  0x31   : > { %1458 = vmatprep.mubr.msk.f32.mxu0 %vm1658_vm2, %v1659_v5 }
  0xf4   : > { %v436_v22 = vpop.f32.mrb[0].mxu1 }
  0xf5   : > { %v1409_v23 = vpop.f32.mrb[1].mxu1  ;;  %v440_v26 = vmul.f32 0.35355338, %v436_v22  ;;  %v1486_v22 = vpack.c.bf16 %v1119_v21, %v1118_v20 }
  0xf6   : > { %v1120_v23 = vld [vmem:[%s1959_s3 + $0x10] sm:$0xff] }
  0xf7   : > { %1488 = vmatpush3.bf16.xpose.msk.msra.mxu0 %vm1765_vm1, %v1486_v22 }
  0xf8   : > { %1489 = vmatprep.subr.bf16.mxu0 %v1657_v2 }
 0x103   : > { %v341_v24 = vpop.f32.mrb[0].mxu0 }
 0x104   : > { %346 = vst.msk [vmem:[#allocation2] sm:$0xff] %vm345_vm3, %v341_v24  ;;  %v1398_v25 = vpop.f32.mrb[1].mxu0  ;;  %v1121_v24 = vld [vmem:[%s1959_s3 + $0x18] sm:$0xff] }
 0x105   : > { %v1490_v25 = vpack.c.bf16 %v1121_v24, %v1120_v23 }
 0x107   : > { %1492 = vmatpush3.bf16.xpose.msk.msra.mxu0 %vm1765_vm1, %v1490_v25 }
 0x10b   : > { %v441_v27 = vld [vmem:[#allocation2] sm:$0xff] }
 0x10c   : > { %608 = vrot.lane.b32.xlu1 %v441_v27, %s1660_s29  ;;  %1411 = vmatpush3.xpose.msk.msra.mxu1 %vm442_vm4, %v441_v27 }
 0x10d   : > { %1415 = vmatprep.subr.mxu1 %v1659_v5 }
 0x10f   : > { %1413 = vmatmul.mubr.msk.f32.vlgmr.msra.gmra.mrb[2].mxu1 %vm442_vm4, %v440_v26 }
 0x110   : > { %606 = vrot.lane.b32.xlu1 %v440_v26, %s1660_s29  ;;  %1417 = vmatprep.mubr.msk.f32.mxu1 %vm1658_vm2, %v1659_v5 }
 0x17e   : > { %v609_v35 = vpop.permute.xlu1 %608 }
 0x182   : > { %v607_v37 = vpop.permute.xlu1 %606 }
 0x1e2   : > { %v515_v28 = vpop.f32.mrb[2].mxu1 }
 0x1e3   : > { %v1414_v29 = vpop.f32.mrb[3].mxu1  ;;  %v519_v30 = vsel %vm442_vm4, %v515_v28, -inf }
 0x1e4   : > { %520 = vmax.xlane.f32.xlu0 %v519_v30 }
 0x1fa   : > { %528 = vrot.lane.b32.xlu0 %v441_v27, %s1661_s7 }
 0x1fe   : > { %693 = vrot.lane.b32.xlu0 %v441_v27, %s1662_s8  ;;  %s1669_s8 = smov 24  }
 0x202   : > { %773 = vrot.lane.b32.xlu0 %v441_v27, %s1663_s9 }
 0x206   : > { %771 = vrot.lane.b32.xlu0 %v440_v26, %s1663_s9  ;;  %s227_s9 = sand.u32 1, %s1639_s19  }
 0x207   : > { %s1216_s25 = scalar_lea.sflag [#allocation4], %s227_s9 }
 0x271   : > { %v521_v31 = vpop.xlane.xlu0 %520 }
 0x272   : > { %v522_v32 = vsub.f32 %v515_v28, %v521_v31 }
 0x274   : > { %v523_v33 = vmul.f32 1.442695, %v522_v32 }
 0x275   : > { %v529_v34 = vpop.permute.xlu0 %528 }
 0x276   : > { %1561 = vpow2.f32 %v523_v33  ;;  %1416 = vmatpush3.msra.mxu1 %v529_v34 }
 0x277   : > { %1420 = vmatprep.subr.mxu1 %v1659_v5 }
 0x279   : > { %v694_v38 = vpop.permute.xlu0 %693 }
 0x27d   : > { %v774_v47 = vpop.permute.xlu0 %773 }
 0x280   : > { %v1840_v36 = vpop.eup %1561 }
 0x281   : > { %1418 = vmatmul.mubr.msk.f32.vlgmr.msra.gmra.mrb[4].mxu1 %vm442_vm4, %v1840_v36  ;;  %v772_v49 = vpop.permute.xlu0 %771 }
 0x282   : > { %1421 = vmatpush3.xpose.msk.msra.mxu1 %vm442_vm4, %v609_v35  ;;  %1422 = vmatprep.mubr.msk.f32.mxu1 %vm1658_vm2, %v1659_v5 }
 0x283   : > { %1425 = vmatprep.subr.mxu1 %v1659_v5 }
 0x285   : > { %1423 = vmatmul.mubr.msk.f32.vlgmr.msra.gmra.mrb[6].mxu1 %vm442_vm4, %v607_v37 }
 0x286   : > { %1426 = vmatpush3.msra.mxu1 %v694_v38  ;;  %1427 = vmatprep.mubr.msk.f32.mxu1 %vm1658_vm2, %v1659_v5  ;;  %v1335_v38 = vld [vmem:[%s1960_s4] ss:$0 sm:$0xff] }
 0x287   : > { %1430 = vmatprep.subr.mxu1 %v1659_v5 }
 0x354   : > { %v1852_v39 = vpop.f32.mrb[4].mxu1 }
 0x355   : > { %v1419_v40 = vpop.f32.mrb[5].mxu1 }
 0x358   : > { %v680_v41 = vpop.f32.mrb[6].mxu1 }
 0x359   : > { %v1424_v42 = vpop.f32.mrb[7].mxu1  ;;  %v684_v43 = vsel %vm442_vm4, %v680_v41, -inf }
 0x35a   : > { %685 = vmax.xlane.f32.xlu1 %v684_v43 }
 0x36b   : > { %858 = vrot.lane.b32.xlu1 %v441_v27, %s1664_s10  ;;  %s1307_s10 = sshll.u32 %s227_s9, 3 }
 0x36f   : > { %938 = vrot.lane.b32.xlu1 %v441_v27, %s1665_s11 }
 0x373   : > { %936 = vrot.lane.b32.xlu1 %v440_v26, %s1665_s11 }
 0x377   : > { %1023 = vrot.lane.b32.xlu1 %v441_v27, %s1666_s12 }
 0x3e7   : > { %v686_v44 = vpop.xlane.xlu1 %685 }
 0x3e8   : > { %v687_v45 = vsub.f32 %v680_v41, %v686_v44 }
 0x3ea   : > { %v688_v46 = vmul.f32 1.442695, %v687_v45 }
 0x3eb   : > { %v859_v50 = vpop.permute.xlu1 %858 }
 0x3ec   : > { %1563 = vpow2.f32 %v688_v46 }
 0x3ef   : > { %v939_v59 = vpop.permute.xlu1 %938 }
 0x3f3   : > { %v937_v60 = vpop.permute.xlu1 %936 }
 0x3f6   : > { %v1564_v48 = vpop.eup %1563 }
 0x3f7   : > { %1428 = vmatmul.mubr.msk.f32.vlgmr.msra.gmra.mrb[8].mxu1 %vm442_vm4, %v1564_v48  ;;  %v1024_v63 = vpop.permute.xlu1 %1023  ;;  %v690_v8 = vsel %vm442_vm4, %v1564_v48, 0.0 }
 0x3f8   : > { %1431 = vmatpush3.xpose.msk.msra.mxu1 %vm442_vm4, %v774_v47  ;;  %1432 = vmatprep.mubr.msk.f32.mxu1 %vm1658_vm2, %v1659_v5 }
 0x3f9   : > { %1435 = vmatprep.subr.mxu1 %v1659_v5 }
 0x3fb   : > { %1433 = vmatmul.mubr.msk.f32.vlgmr.msra.gmra.mrb[10].mxu1 %vm442_vm4, %v772_v49 }
 0x3fc   : > { %1436 = vmatpush3.msra.mxu1 %v859_v50  ;;  %1437 = vmatprep.mubr.msk.f32.mxu1 %vm1658_vm2, %v1659_v5 }
 0x3fd   : > { %1440 = vmatprep.subr.mxu1 %v1659_v5 }
 0x4ca   : > { %v765_v51 = vpop.f32.mrb[8].mxu1 }
 0x4cb   : > { %v1429_v52 = vpop.f32.mrb[9].mxu1 }
 0x4ce   : > { %v845_v53 = vpop.f32.mrb[10].mxu1 }
 0x4cf   : > { %v1434_v54 = vpop.f32.mrb[11].mxu1  ;;  %v849_v55 = vsel %vm442_vm4, %v845_v53, -inf }
 0x4d0   : > { %850 = vmax.xlane.f32.xlu0 %v849_v55 }
 0x55d   : > { %v851_v56 = vpop.xlane.xlu0 %850 }
 0x55e   : > { %v852_v57 = vsub.f32 %v845_v53, %v851_v56 }
 0x560   : > { %v853_v58 = vmul.f32 1.442695, %v852_v57 }
 0x562   : > { %1565 = vpow2.f32 %v853_v58 }
 0x56c   : > { %v1566_v61 = vpop.eup %1565 }
 0x56d   : > { %1438 = vmatmul.mubr.msk.f32.vlgmr.msra.gmra.mrb[12].mxu1 %vm442_vm4, %v1566_v61  ;;  %v855_v62 = vsel %vm442_vm4, %v1566_v61, 0.0 }
 0x56e   : > { %1441 = vmatpush3.xpose.msk.msra.mxu1 %vm442_vm4, %v939_v59  ;;  %856 = vadd.xlane.f32.xlu1 %v855_v62 }
 0x56f   : > { %1442 = vmatprep.mubr.msk.f32.mxu1 %vm1658_vm2, %v1659_v5  ;;  %1445 = vmatprep.subr.mxu1 %v1659_v5 }
 0x571   : > { %1443 = vmatmul.mubr.msk.f32.vlgmr.msra.gmra.mrb[14].mxu1 %vm442_vm4, %v937_v60 }
 0x572   : > { %1446 = vmatpush3.msra.mxu1 %v1024_v63  ;;  %1447 = vmatprep.mubr.msk.f32.mxu1 %vm1658_vm2, %v1659_v5  ;;  %v525_v5 = vsel %vm442_vm4, %v1840_v36, 0.0 }
 0x5fb   : > { %v857_v15 = vpop.xlane.xlu1 %856 }
 0x640   : > { %v930_v0 = vpop.f32.mrb[12].mxu1 }
 0x641   : > { %v1439_v1 = vpop.f32.mrb[13].mxu1 }
 0x644   : > { %v1010_v3 = vpop.f32.mrb[14].mxu1 }
 0x645   : > { %v1444_v6 = vpop.f32.mrb[15].mxu1  ;;  %v1014_v7 = vsel %vm442_vm4, %v1010_v3, -inf }
 0x646   : > { %1015 = vmax.xlane.f32.xlu0 %v1014_v7 }
 0x64a   : > { %691 = vadd.xlane.f32.xlu0 %v690_v8 }
 0x6d3   : > { %v1016_v9 = vpop.xlane.xlu0 %1015 }
 0x6d4   : > { %v1017_v10 = vsub.f32 %v1010_v3, %v1016_v9 }
 0x6d6   : > { %v1018_v11 = vmul.f32 1.442695, %v1017_v10 }
 0x6d7   : > { %v692_v14 = vpop.xlane.xlu0 %691 }
 0x6d8   : > { %1567 = vpow2.f32 %v1018_v11 }
 0x6d9   : > { %1569 = vrcp.f32 %v692_v14 }
 0x6da   : > { %1571 = vrcp.f32 %v857_v15 }
 0x6e2   : > { %v1568_v12 = vpop.eup %1567 }
 0x6e3   : > { %1448 = vmatmul.mubr.msk.f32.vlgmr.msra.gmra.mrb[16].mxu1 %vm442_vm4, %v1568_v12  ;;  %v1020_v13 = vsel %vm442_vm4, %v1568_v12, 0.0  ;;  %v1570_v16 = vpop.eup %1569 }
 0x6e4   : > { %1021 = vadd.xlane.f32.xlu0 %v1020_v13  ;;  %v770_v17 = vmul.f32 %v1570_v16, %v765_v51  ;;  %v1572_v18 = vpop.eup %1571 }
 0x6e5   : > { %v935_v19 = vmul.f32 %v1572_v18, %v930_v0 }
 0x6e8   : > { %526 = vadd.xlane.f32.xlu0 %v525_v5 }
 0x6fe   : > { %1102 = vrot.lane.b32.xlu0 %v770_v17, %s1667_s13  ;;  %s1342_s13 = sshll.u32 %s1647_s21, 7  ;;  %s1670_s21 = smov [#allocation3]  }
 0x6ff   : > { %s1908_s24 = scalar_lea.hbm %s1961_s5, %s1342_s13  ;;  %s1581_s29 = sshll.u32 %s1670_s21, 4  ;;  %s1582_s29 = int_to_ptr.vmem [resolvable:$false] %s1581_s29 }
 0x700   : > { %s1583_s7 = scalar_lea.vmem %s1582_s29, 256 }
 0x702   : > { %1106 = vrot.lane.b32.xlu0 %v935_v19, %s1668_s14  ;;  %s229_s14 = scalar_lea.vmem [#allocation3], %s1307_s10 }
 0x703   : > { %s1230_s15 = sshll.u32 %s229_s14, 4  ;;  %s1910_s15 = int_to_ptr.vmem [resolvable:$true] %s1230_s15 }
 0x704   : > { %s1577_s27 = scalar_lea.vmem %s1910_s15, 128  ;;  %p1584_p1 = scmp.lt.s32.totalorder %s1910_s15, %s1582_s29 }
 0x705   : > { %p1578_p12 = scmp.ne.s32.totalorder %s1910_s15, %s1577_s27  ;;  %p1585_p2 = scmp.lt.s32.totalorder %s1583_s7, %s1577_s27 }
 0x707   : > { %p1579_p13 = pnand %p1578_p12, %p1741_p4  ;;  %p1586_p3 = por %p1585_p2, %p1584_p1 }
 0x709   : > { %p1580_p0 = pneg %p1579_p13 }
 0x70b   : > { %p1587_p5 = pnand %p1586_p3, %p1580_p0 }
 0x771   : > { %v1022_v26 = vpop.xlane.xlu0 %1021 }
 0x772   : > { %1573 = vrcp.f32 %v1022_v26 }
 0x775   : > { %v527_v2 = vpop.xlane.xlu0 %526 }
 0x776   : > { %1575 = vrcp.f32 %v527_v2 }
 0x779   : > { %v1103_v33 = vpop.permute.xlu0 %1102 }
 0x77c   : > { %v1574_v27 = vpop.eup %1573 }
 0x77d   : > { %v1107_v4 = vpop.permute.xlu0 %1106 }
 0x780   : > { %v1576_v31 = vpop.eup %1575 }
 0x781   : > { %v605_v32 = vmul.f32 %v1576_v31, %v1852_v39 }
 0x783   : > { %v1113_v34 = vsel %vm442_vm4, %v605_v32, %v1103_v33 }
 0x784   : > { %v1115_v35 = vsel %vm1114_vm5, %v1113_v34, %v1107_v4 }
 0x7b6   : > { %v1095_v28 = vpop.f32.mrb[16].mxu1 }
 0x7b7   : > { %v1100_v29 = vmul.f32 %v1574_v27, %v1095_v28  ;;  %v1449_v30 = vpop.f32.mrb[17].mxu1 }
 0x7b9   : > { %1110 = vrot.lane.b32.xlu1 %v1100_v29, %s1669_s8 }
 0x82b   : > { %v1111_v36 = vpop.permute.xlu1 %1110 }
 0x82c   : > { %v1117_v37 = vsel %vm1116_vm6, %v1115_v35, %v1111_v36 }
 0x82d   : > { %1459 = vmatmul.mubr.msk.f32.vlgmr.msra.gmra.mrb[2].mxu0 %vm247_vm0, %v1117_v37 }
 0x900   : > { %v1210_v39 = vpop.f32.mrb[2].mxu0 }
 0x901   : > { %v1211_v40 = vadd.f32 %v1335_v38, %v1210_v39  ;;  %v1460_v41 = vpop.f32.mrb[3].mxu0 }
 0x903   : > { %1214 = vst.msk [vmem:[%s229_s14] sm:$0xff] %vm247_vm0, %v1211_v40 }
 0x904   : > { %1590 = shalt.err (!%p1587_p5)
}
 0x905   : > { %s1591_s8 = scalar_lea.hbm %s1908_s24, 128  ;;  %s1595_s11 = scalar_lea.hbm %s1961_s5, 256 }
 0x906   : > { %p1592_p6 = scmp.ne.s32.totalorder %s1908_s24, %s1591_s8  ;;  %p1596_p10 = scmp.lt.u32.totalorder %s1908_s24, %s1961_s5 }
 0x907   : > { %p1597_p11 = scmp.lt.u32.totalorder %s1595_s11, %s1591_s8  ;;  %p1599_p13 = scmp.lt.u32.totalorder %s1591_s8, %s1908_s24 }
 0x908   : > { %p1593_p7 = pnand %p1592_p6, %p1741_p4 }
 0x909   : > { %p1598_p12 = por %p1597_p11, %p1596_p10 }
 0x90a   : > { %p1594_p9 = pneg %p1593_p7 }
 0x90b   : > { %p1600_p0 = por %p1599_p13, %p1598_p12 }
 0x90d   : > { %p1601_p1 = pnand %p1600_p0, %p1594_p9 }
 0x90f   : > { %1604 = shalt.err (!%p1601_p1)
}
 0x910   : > { %1493 = dma.vmem_to_hbm [thread:$0]  (%p1741_p4), %s1910_s15, 128, %s1908_s24, %s1216_s25  }
 0x911 PF: > { %p1499_p2 = scmp.ge.s32.totalorder %s1655_s23, 2  ;;  %s1242_s14 = sand.u32 1, %s1635_s18  }
 0x912   : > { %s1243_s16 = scalar_lea.sflag [#allocation4], %s1242_s14 }
 0x913   : > { %p1496_p3 = pnand %p1499_p2, %p1748_p8 }
 0x915   : > { %1630 = dma.done.wait (!%p1496_p3), %s1243_s16, 128  }
 0x916   : > { %1632 = vsyncadd (!%p1496_p3), %s1243_s16, 4294967168  ;;  %s18_s23 = sadd.s32 1, %s1655_s23   ;;  %s1966_s18 = smov %s1639_s19 }
 0x917   : > { %p15_p5 = scmp.ge.s32.totalorder %s18_s23, 4   ;;  %s1967_s19 = smov %s1643_s20 }
 0x918   : > { %s1968_s20 = smov %s1754_s6  ;;  %s1969_s21 = smov %s1651_s22 }
 0x919   : > { %s1970_s22 = smov %s1972_s26  ;;  %17 = sbr.rel (!%p15_p5) target bundleno = 4 (0x4), region = 80 }
 0x920   :  { %1248 = vsyncpa [#allocation4], 1 }
 0x921   :  { %1250 = vsyncpa [#allocation4 + $0x1], 1 }

// kernel: tpu_custom_call.1
= control target key start
LH: loop header
LB: loop body
LE: loop exit
PB: predicated region body
PF: predicated region fallthrough
CT: control target
= control target key end

     0   :  { %10 = vsyncpa [#allocation4], 0  ;;  %s1954_s0 = inlined_call_operand.vmem [shape: f32[2,8,32], index: 0, kind: input, shape index: {}]   ;;  %s1955_s1 = inlined_call_operand.vmem [shape: f32[32,32], index: 1, kind: input, shape index: {}]   ;;  %s1956_s2 = inlined_call_operand.vmem [shape: f32[64,32], index: 2, kind: input, shape index: {}]   ;;  %s1957_s3 = inlined_call_operand.vmem [shape: f32[32,32], index: 3, kind: input, shape index: {}]   ;;  %s1958_s4 = inlined_call_operand.vmem [shape: f32[1,32], index: 4, kind: input, shape index: {}]   ;;  %s1959_s5 = inlined_call_operand.hbm [shape: f32[2,8,32], index: 5, kind: output, shape index: {}]  }
   0x1   :  { %12 = vsyncpa [#allocation4 + $0x1], 0  ;;  %s1699_s18 = smov 0   ;;  %s1701_s19 = smov 0  }
   0x2   :  { %s1703_s20 = smov 0   ;;  %s1705_s21 = smov 0  }
   0x3   :  { %s1707_s22 = smov 0   ;;  %s1709_s23 = smov 0  }
   0x4 LB: > { %s1300_s24 = sadd.s32 4294967295, %s1653_s23   ;;  %s1301_s25 = sadd.s32 4294967294, %s1653_s23   ;;  %s1653_s23 = sphi %s1709_s23, %s18_s23   ;;  %s1649_s22 = sphi %s1707_s22, %s1968_s22   ;;  %s1645_s21 = sphi %s1705_s21, %s1967_s21   ;;  %s1641_s20 = sphi %s1703_s20, %s1966_s20   ;;  %s1637_s19 = sphi %s1701_s19, %s1965_s19   ;;  %s1633_s18 = sphi %s1699_s18, %s1964_s18  }
   0x5   : > { %s30_s26 = sadd.s32 1, %s1649_s22  ;;  %s149_s27 = sadd.s32 1, %s1641_s20 }
   0x6   : > { %p32_p0 = scmp.ge.s32.totalorder %s30_s26, 2  ;;  %p159_p1 = scmp.ne.s32.totalorder %s1641_s20, %s1637_s19 }
   0x7   : > { %p160_p2 = scmp.eq.s32.totalorder %s1300_s24, 1  ;;  %p165_p3 = scmp.ne.s32.totalorder %s1637_s19, %s1633_s18 }
   0x8   : > { %s1970_s26 = smov (%p32_p0, %s30_s26), 0  ;;  %p166_p5 = scmp.eq.s32.totalorder %s1301_s25, 1 }
   0x9   : > { %p1739_p4 = por %p160_p2, %p159_p1  ;;  %s144_s29 = ssub.s32 %s1649_s22, %s1970_s26 }
   0xa   : > { %p1304_p6 = scmp.ge.s32.totalorder %s1653_s23, 1  ;;  %p147_p7 = scmp.eq.s32.totalorder %s144_s29, 0 }
   0xb   : > { %p1746_p8 = por %p166_p5, %p165_p3  ;;  %p203_p9 = scmp.lt.s32.totalorder %s1653_s23, 3 }
   0xc   : > { %s1752_s6 = scalar_select %p147_p7, %s1641_s20, %s149_s27  }
   0xd   : > { %p204_p10 = pnand %p1304_p6, %p203_p9 }
   0xe   : > { %v239_v0 = vld [vmem:[%s1956_s2] sm:$0xff] (!%p204_p10)  ;;  %v240_v1 = vld [vmem:[%s1956_s2 + $0x8] sm:$0xff] (!%p204_p10)  ;;  %vm247_vm0 = vcmask (!%p204_p10), 261120   ;;  %v1655_v2 = vmov (!%p204_p10), 0.0|0.0   ;;  %vm1656_vm2 = vmmov (!%p204_p10), 0   ;;  %v1657_v5 = vmov (!%p204_p10), 0.0  }
   0xf   : > { %207 = sbr.rel (%p204_p10) target bundleno = 2321 (0x911), region = 40  ;;  %1459 = vmatprep.subr.bf16.mxu0 (!%p204_p10), %v1655_v2  ;;  %v1460_v3 = vpack.c.bf16 (!%p204_p10), %v240_v1, %v239_v0  ;;  %vm1763_vm1 = vmpackc.low (!%p204_p10), %vm247_vm0, %vm247_vm0  ;;  %1475 = vmatprep.subr.bf16.mxu1 (!%p204_p10), %v1655_v2  ;;  %v350_v6 = vld [vmem:[%s1955_s1] sm:$0xff] (!%p204_p10)  ;;  %v351_v7 = vld [vmem:[%s1955_s1 + $0x8] sm:$0xff] (!%p204_p10)  ;;  %p230_p11 = scmp.lt.s32.totalorder (!%p204_p10), %s1645_s21, 1  ;;  %vm345_vm3 = vcmask (!%p204_p10), 523264   ;;  %vm442_vm4 = vcmask (!%p204_p10), 64512  }
  0x10   : > { %1394 = vmatprep.mubr.msk.f32.mxu0 (!%p204_p10), %vm1656_vm2, %v1657_v5  ;;  %1405 = vmatprep.mubr.msk.f32.mxu1 (!%p204_p10), %vm1656_vm2, %v1657_v5  ;;  %v241_v8 = vld [vmem:[%s1956_s2 + $0x10] sm:$0xff] (!%p204_p10)  ;;  %v242_v9 = vld [vmem:[%s1956_s2 + $0x18] sm:$0xff] (!%p204_p10)  ;;  %v1476_v10 = vpack.c.bf16 (!%p204_p10), %v351_v7, %v350_v6  ;;  %v243_v15 = vld [vmem:[%s1956_s2 + $0x20] sm:$0xff] (!%p204_p10)  ;;  %s1658_s29 = smov (!%p204_p10), 120   ;;  %s1659_s7 = smov (!%p204_p10), 96   ;;  %vm1114_vm5 = vcmask (!%p204_p10), 130048  }
  0x11   : > { %1462 = vmatpush3.bf16.xpose.msk.msra.mxu0 (!%p204_p10), %vm1763_vm1, %v1460_v3  ;;  %v1464_v11 = vpack.c.bf16 (!%p204_p10), %v242_v9, %v241_v8  ;;  %v352_v12 = vld [vmem:[%s1955_s1 + $0x10] sm:$0xff] (!%p204_p10)  ;;  %v353_v13 = vld [vmem:[%s1955_s1 + $0x18] sm:$0xff] (!%p204_p10)  ;;  %v244_v16 = vld [vmem:[%s1956_s2 + $0x28] sm:$0xff] (!%p204_p10)  ;;  %s1661_s9 = smov (!%p204_p10), 112   ;;  %s1662_s10 = smov (!%p204_p10), 80   ;;  %vm1116_vm6 = vcmask (!%p204_p10), 195584  }
  0x12   : > { %1463 = vmatprep.subr.bf16.mxu0 (!%p204_p10), %v1655_v2  ;;  %1478 = vmatpush3.bf16.xpose.msk.msra.mxu1 (!%p204_p10), %vm1763_vm1, %v1476_v10  ;;  %v1480_v14 = vpack.c.bf16 (!%p204_p10), %v353_v13, %v352_v12  ;;  %v1468_v17 = vpack.c.bf16 (!%p204_p10), %v244_v16, %v243_v15  ;;  %v245_v18 = vld [vmem:[%s1956_s2 + $0x30] sm:$0xff] (!%p204_p10)  ;;  %v246_v19 = vld [vmem:[%s1956_s2 + $0x38] sm:$0xff] (!%p204_p10)  ;;  %s1663_s11 = smov (!%p204_p10), 104   ;;  %s1664_s12 = smov (!%p204_p10), 72  }
  0x13   : > { %1479 = vmatprep.subr.bf16.mxu1 (!%p204_p10), %v1655_v2  ;;  %v1472_v21 = vpack.c.bf16 (!%p204_p10), %v246_v19, %v245_v18  ;;  %s1666_s14 = smov (!%p204_p10), 16  }
  0x16   : > { %s231_s8 = scalar_select %p230_p11, %s1645_s21, 1 }
  0x18   : > { %s1306_s13 = sshll.u32 %s231_s8, 3  ;;  %s1660_s8 = smov 88  }
  0x19   : > { %1466 = vmatpush3.bf16.xpose.msk.msra.mxu0 %vm1763_vm1, %v1464_v11  ;;  %s233_s16 = scalar_lea.vmem %s1954_s0, %s1306_s13  ;;  %s1665_s13 = smov 8  }
  0x1a   : > { %1467 = vmatprep.subr.bf16.mxu0 %v1655_v2  ;;  %1482 = vmatpush3.bf16.xpose.msk.msra.mxu1 %vm1763_vm1, %v1480_v14  ;;  %v238_v20 = vld [vmem:[%s233_s16] sm:$0xff] }
  0x1b   : > { %1408 = vmatprep.subr.mxu1 %v1657_v5 }
  0x21   : > { %1470 = vmatpush3.bf16.xpose.msk.msra.mxu0 %vm1763_vm1, %v1468_v17  ;;  %1406 = vmatmul.mubr.msk.f32.vlgmr.msra.gmra.mrb[0].mxu1 %vm247_vm0, %v238_v20 }
  0x22   : > { %1471 = vmatprep.subr.bf16.mxu0 %v1655_v2  ;;  %1410 = vmatprep.mubr.msk.f32.mxu1 %vm1656_vm2, %v1657_v5 }
  0x29   : > { %1474 = vmatpush3.bf16.xpose.msk.msra.mxu0 %vm1763_vm1, %v1472_v21  ;;  %v1119_v21 = vld [vmem:[%s1957_s3 + $0x8] sm:$0xff] }
  0x2a   : > { %1483 = vmatprep.subr.bf16.mxu0 %v1655_v2 }
  0x30   : > { %1395 = vmatmul.mubr.msk.f32.vlgmr.msra.gmra.mrb[0].mxu0 %vm247_vm0, %v238_v20  ;;  %v1118_v20 = vld [vmem:[%s1957_s3] sm:$0xff] }
  0x31   : > { %1456 = vmatprep.mubr.msk.f32.mxu0 %vm1656_vm2, %v1657_v5 }
  0xf4   : > { %v436_v22 = vpop.f32.mrb[0].mxu1 }
  0xf5   : > { %v1407_v23 = vpop.f32.mrb[1].mxu1  ;;  %v440_v26 = vmul.f32 0.35355338, %v436_v22  ;;  %v1484_v22 = vpack.c.bf16 %v1119_v21, %v1118_v20 }
  0xf6   : > { %v1120_v23 = vld [vmem:[%s1957_s3 + $0x10] sm:$0xff] }
  0xf7   : > { %1486 = vmatpush3.bf16.xpose.msk.msra.mxu0 %vm1763_vm1, %v1484_v22 }
  0xf8   : > { %1487 = vmatprep.subr.bf16.mxu0 %v1655_v2 }
 0x103   : > { %v341_v24 = vpop.f32.mrb[0].mxu0 }
 0x104   : > { %346 = vst.msk [vmem:[#allocation2] sm:$0xff] %vm345_vm3, %v341_v24  ;;  %v1396_v25 = vpop.f32.mrb[1].mxu0  ;;  %v1121_v24 = vld [vmem:[%s1957_s3 + $0x18] sm:$0xff] }
 0x105   : > { %v1488_v25 = vpack.c.bf16 %v1121_v24, %v1120_v23 }
 0x107   : > { %1490 = vmatpush3.bf16.xpose.msk.msra.mxu0 %vm1763_vm1, %v1488_v25 }
 0x10b   : > { %v441_v27 = vld [vmem:[#allocation2] sm:$0xff] }
 0x10c   : > { %608 = vrot.lane.b32.xlu1 %v441_v27, %s1658_s29  ;;  %1409 = vmatpush3.xpose.msk.msra.mxu1 %vm442_vm4, %v441_v27 }
 0x10d   : > { %1413 = vmatprep.subr.mxu1 %v1657_v5 }
 0x10f   : > { %1411 = vmatmul.mubr.msk.f32.vlgmr.msra.gmra.mrb[2].mxu1 %vm442_vm4, %v440_v26 }
 0x110   : > { %606 = vrot.lane.b32.xlu1 %v440_v26, %s1658_s29  ;;  %1415 = vmatprep.mubr.msk.f32.mxu1 %vm1656_vm2, %v1657_v5 }
 0x17e   : > { %v609_v35 = vpop.permute.xlu1 %608 }
 0x182   : > { %v607_v37 = vpop.permute.xlu1 %606 }
 0x1e2   : > { %v515_v28 = vpop.f32.mrb[2].mxu1 }
 0x1e3   : > { %v1412_v29 = vpop.f32.mrb[3].mxu1  ;;  %v519_v30 = vsel %vm442_vm4, %v515_v28, -inf }
 0x1e4   : > { %520 = vmax.xlane.f32.xlu0 %v519_v30 }
 0x1fa   : > { %528 = vrot.lane.b32.xlu0 %v441_v27, %s1659_s7 }
 0x1fe   : > { %693 = vrot.lane.b32.xlu0 %v441_v27, %s1660_s8  ;;  %s1667_s8 = smov 24  }
 0x202   : > { %773 = vrot.lane.b32.xlu0 %v441_v27, %s1661_s9 }
 0x206   : > { %771 = vrot.lane.b32.xlu0 %v440_v26, %s1661_s9  ;;  %s227_s9 = sand.u32 1, %s1637_s19  }
 0x207   : > { %s1216_s25 = scalar_lea.sflag [#allocation4], %s227_s9 }
 0x271   : > { %v521_v31 = vpop.xlane.xlu0 %520 }
 0x272   : > { %v522_v32 = vsub.f32 %v515_v28, %v521_v31 }
 0x274   : > { %v523_v33 = vmul.f32 1.442695, %v522_v32 }
 0x275   : > { %v529_v34 = vpop.permute.xlu0 %528 }
 0x276   : > { %1559 = vpow2.f32 %v523_v33  ;;  %1414 = vmatpush3.msra.mxu1 %v529_v34 }
 0x277   : > { %1418 = vmatprep.subr.mxu1 %v1657_v5 }
 0x279   : > { %v694_v38 = vpop.permute.xlu0 %693 }
 0x27d   : > { %v774_v47 = vpop.permute.xlu0 %773 }
 0x280   : > { %v1838_v36 = vpop.eup %1559 }
 0x281   : > { %1416 = vmatmul.mubr.msk.f32.vlgmr.msra.gmra.mrb[4].mxu1 %vm442_vm4, %v1838_v36  ;;  %v772_v49 = vpop.permute.xlu0 %771 }
 0x282   : > { %1419 = vmatpush3.xpose.msk.msra.mxu1 %vm442_vm4, %v609_v35  ;;  %1420 = vmatprep.mubr.msk.f32.mxu1 %vm1656_vm2, %v1657_v5 }
 0x283   : > { %1423 = vmatprep.subr.mxu1 %v1657_v5 }
 0x285   : > { %1421 = vmatmul.mubr.msk.f32.vlgmr.msra.gmra.mrb[6].mxu1 %vm442_vm4, %v607_v37 }
 0x286   : > { %1424 = vmatpush3.msra.mxu1 %v694_v38  ;;  %1425 = vmatprep.mubr.msk.f32.mxu1 %vm1656_vm2, %v1657_v5  ;;  %v1333_v38 = vld [vmem:[%s1958_s4] ss:$0 sm:$0xff] }
 0x287   : > { %1428 = vmatprep.subr.mxu1 %v1657_v5 }
 0x354   : > { %v1850_v39 = vpop.f32.mrb[4].mxu1 }
 0x355   : > { %v1417_v40 = vpop.f32.mrb[5].mxu1 }
 0x358   : > { %v680_v41 = vpop.f32.mrb[6].mxu1 }
 0x359   : > { %v1422_v42 = vpop.f32.mrb[7].mxu1  ;;  %v684_v43 = vsel %vm442_vm4, %v680_v41, -inf }
 0x35a   : > { %685 = vmax.xlane.f32.xlu1 %v684_v43 }
 0x36b   : > { %858 = vrot.lane.b32.xlu1 %v441_v27, %s1662_s10  ;;  %s1305_s10 = sshll.u32 %s227_s9, 3 }
 0x36f   : > { %938 = vrot.lane.b32.xlu1 %v441_v27, %s1663_s11 }
 0x373   : > { %936 = vrot.lane.b32.xlu1 %v440_v26, %s1663_s11 }
 0x377   : > { %1023 = vrot.lane.b32.xlu1 %v441_v27, %s1664_s12 }
 0x3e7   : > { %v686_v44 = vpop.xlane.xlu1 %685 }
 0x3e8   : > { %v687_v45 = vsub.f32 %v680_v41, %v686_v44 }
 0x3ea   : > { %v688_v46 = vmul.f32 1.442695, %v687_v45 }
 0x3eb   : > { %v859_v50 = vpop.permute.xlu1 %858 }
 0x3ec   : > { %1561 = vpow2.f32 %v688_v46 }
 0x3ef   : > { %v939_v59 = vpop.permute.xlu1 %938 }
 0x3f3   : > { %v937_v60 = vpop.permute.xlu1 %936 }
 0x3f6   : > { %v1562_v48 = vpop.eup %1561 }
 0x3f7   : > { %1426 = vmatmul.mubr.msk.f32.vlgmr.msra.gmra.mrb[8].mxu1 %vm442_vm4, %v1562_v48  ;;  %v1024_v63 = vpop.permute.xlu1 %1023  ;;  %v690_v8 = vsel %vm442_vm4, %v1562_v48, 0.0 }
 0x3f8   : > { %1429 = vmatpush3.xpose.msk.msra.mxu1 %vm442_vm4, %v774_v47  ;;  %1430 = vmatprep.mubr.msk.f32.mxu1 %vm1656_vm2, %v1657_v5 }
 0x3f9   : > { %1433 = vmatprep.subr.mxu1 %v1657_v5 }
 0x3fb   : > { %1431 = vmatmul.mubr.msk.f32.vlgmr.msra.gmra.mrb[10].mxu1 %vm442_vm4, %v772_v49 }
 0x3fc   : > { %1434 = vmatpush3.msra.mxu1 %v859_v50  ;;  %1435 = vmatprep.mubr.msk.f32.mxu1 %vm1656_vm2, %v1657_v5 }
 0x3fd   : > { %1438 = vmatprep.subr.mxu1 %v1657_v5 }
 0x4ca   : > { %v765_v51 = vpop.f32.mrb[8].mxu1 }
 0x4cb   : > { %v1427_v52 = vpop.f32.mrb[9].mxu1 }
 0x4ce   : > { %v845_v53 = vpop.f32.mrb[10].mxu1 }
 0x4cf   : > { %v1432_v54 = vpop.f32.mrb[11].mxu1  ;;  %v849_v55 = vsel %vm442_vm4, %v845_v53, -inf }
 0x4d0   : > { %850 = vmax.xlane.f32.xlu0 %v849_v55 }
 0x55d   : > { %v851_v56 = vpop.xlane.xlu0 %850 }
 0x55e   : > { %v852_v57 = vsub.f32 %v845_v53, %v851_v56 }
 0x560   : > { %v853_v58 = vmul.f32 1.442695, %v852_v57 }
 0x562   : > { %1563 = vpow2.f32 %v853_v58 }
 0x56c   : > { %v1564_v61 = vpop.eup %1563 }
 0x56d   : > { %1436 = vmatmul.mubr.msk.f32.vlgmr.msra.gmra.mrb[12].mxu1 %vm442_vm4, %v1564_v61  ;;  %v855_v62 = vsel %vm442_vm4, %v1564_v61, 0.0 }
 0x56e   : > { %1439 = vmatpush3.xpose.msk.msra.mxu1 %vm442_vm4, %v939_v59  ;;  %856 = vadd.xlane.f32.xlu1 %v855_v62 }
 0x56f   : > { %1440 = vmatprep.mubr.msk.f32.mxu1 %vm1656_vm2, %v1657_v5  ;;  %1443 = vmatprep.subr.mxu1 %v1657_v5 }
 0x571   : > { %1441 = vmatmul.mubr.msk.f32.vlgmr.msra.gmra.mrb[14].mxu1 %vm442_vm4, %v937_v60 }
 0x572   : > { %1444 = vmatpush3.msra.mxu1 %v1024_v63  ;;  %1445 = vmatprep.mubr.msk.f32.mxu1 %vm1656_vm2, %v1657_v5  ;;  %v525_v5 = vsel %vm442_vm4, %v1838_v36, 0.0 }
 0x5fb   : > { %v857_v15 = vpop.xlane.xlu1 %856 }
 0x640   : > { %v930_v0 = vpop.f32.mrb[12].mxu1 }
 0x641   : > { %v1437_v1 = vpop.f32.mrb[13].mxu1 }
 0x644   : > { %v1010_v3 = vpop.f32.mrb[14].mxu1 }
 0x645   : > { %v1442_v6 = vpop.f32.mrb[15].mxu1  ;;  %v1014_v7 = vsel %vm442_vm4, %v1010_v3, -inf }
 0x646   : > { %1015 = vmax.xlane.f32.xlu0 %v1014_v7 }
 0x64a   : > { %691 = vadd.xlane.f32.xlu0 %v690_v8 }
 0x6d3   : > { %v1016_v9 = vpop.xlane.xlu0 %1015 }
 0x6d4   : > { %v1017_v10 = vsub.f32 %v1010_v3, %v1016_v9 }
 0x6d6   : > { %v1018_v11 = vmul.f32 1.442695, %v1017_v10 }
 0x6d7   : > { %v692_v14 = vpop.xlane.xlu0 %691 }
 0x6d8   : > { %1565 = vpow2.f32 %v1018_v11 }
 0x6d9   : > { %1567 = vrcp.f32 %v692_v14 }
 0x6da   : > { %1569 = vrcp.f32 %v857_v15 }
 0x6e2   : > { %v1566_v12 = vpop.eup %1565 }
 0x6e3   : > { %1446 = vmatmul.mubr.msk.f32.vlgmr.msra.gmra.mrb[16].mxu1 %vm442_vm4, %v1566_v12  ;;  %v1020_v13 = vsel %vm442_vm4, %v1566_v12, 0.0  ;;  %v1568_v16 = vpop.eup %1567 }
 0x6e4   : > { %1021 = vadd.xlane.f32.xlu0 %v1020_v13  ;;  %v770_v17 = vmul.f32 %v1568_v16, %v765_v51  ;;  %v1570_v18 = vpop.eup %1569 }
 0x6e5   : > { %v935_v19 = vmul.f32 %v1570_v18, %v930_v0 }
 0x6e8   : > { %526 = vadd.xlane.f32.xlu0 %v525_v5 }
 0x6fe   : > { %1102 = vrot.lane.b32.xlu0 %v770_v17, %s1665_s13  ;;  %s1340_s13 = sshll.u32 %s1645_s21, 7  ;;  %s1668_s21 = smov [#allocation3]  }
 0x6ff   : > { %s1906_s24 = scalar_lea.hbm %s1959_s5, %s1340_s13  ;;  %s1579_s29 = sshll.u32 %s1668_s21, 4  ;;  %s1580_s29 = int_to_ptr.vmem [resolvable:$false] %s1579_s29 }
 0x700   : > { %s1581_s7 = scalar_lea.vmem %s1580_s29, 256 }
 0x702   : > { %1106 = vrot.lane.b32.xlu0 %v935_v19, %s1666_s14  ;;  %s229_s14 = scalar_lea.vmem [#allocation3], %s1305_s10 }
 0x703   : > { %s1230_s15 = sshll.u32 %s229_s14, 4  ;;  %s1908_s15 = int_to_ptr.vmem [resolvable:$true] %s1230_s15 }
 0x704   : > { %s1575_s27 = scalar_lea.vmem %s1908_s15, 128  ;;  %p1582_p1 = scmp.lt.s32.totalorder %s1908_s15, %s1580_s29 }
 0x705   : > { %p1576_p12 = scmp.ne.s32.totalorder %s1908_s15, %s1575_s27  ;;  %p1583_p2 = scmp.lt.s32.totalorder %s1581_s7, %s1575_s27 }
 0x707   : > { %p1577_p13 = pnand %p1576_p12, %p1739_p4  ;;  %p1584_p3 = por %p1583_p2, %p1582_p1 }
 0x709   : > { %p1578_p0 = pneg %p1577_p13 }
 0x70b   : > { %p1585_p5 = pnand %p1584_p3, %p1578_p0 }
 0x771   : > { %v1022_v26 = vpop.xlane.xlu0 %1021 }
 0x772   : > { %1571 = vrcp.f32 %v1022_v26 }
 0x775   : > { %v527_v2 = vpop.xlane.xlu0 %526 }
 0x776   : > { %1573 = vrcp.f32 %v527_v2 }
 0x779   : > { %v1103_v33 = vpop.permute.xlu0 %1102 }
 0x77c   : > { %v1572_v27 = vpop.eup %1571 }
 0x77d   : > { %v1107_v4 = vpop.permute.xlu0 %1106 }
 0x780   : > { %v1574_v31 = vpop.eup %1573 }
 0x781   : > { %v605_v32 = vmul.f32 %v1574_v31, %v1850_v39 }
 0x783   : > { %v1113_v34 = vsel %vm442_vm4, %v605_v32, %v1103_v33 }
 0x784   : > { %v1115_v35 = vsel %vm1114_vm5, %v1113_v34, %v1107_v4 }
 0x7b6   : > { %v1095_v28 = vpop.f32.mrb[16].mxu1 }
 0x7b7   : > { %v1100_v29 = vmul.f32 %v1572_v27, %v1095_v28  ;;  %v1447_v30 = vpop.f32.mrb[17].mxu1 }
 0x7b9   : > { %1110 = vrot.lane.b32.xlu1 %v1100_v29, %s1667_s8 }
 0x82b   : > { %v1111_v36 = vpop.permute.xlu1 %1110 }
 0x82c   : > { %v1117_v37 = vsel %vm1116_vm6, %v1115_v35, %v1111_v36 }
 0x82d   : > { %1457 = vmatmul.mubr.msk.f32.vlgmr.msra.gmra.mrb[2].mxu0 %vm247_vm0, %v1117_v37 }
 0x900   : > { %v1210_v39 = vpop.f32.mrb[2].mxu0 }
 0x901   : > { %v1211_v40 = vadd.f32 %v1333_v38, %v1210_v39  ;;  %v1458_v41 = vpop.f32.mrb[3].mxu0 }
 0x903   : > { %1214 = vst.msk [vmem:[%s229_s14] sm:$0xff] %vm247_vm0, %v1211_v40 }
 0x904   : > { %1588 = shalt.err (!%p1585_p5)
}
 0x905   : > { %s1589_s8 = scalar_lea.hbm %s1906_s24, 128  ;;  %s1593_s11 = scalar_lea.hbm %s1959_s5, 256 }
 0x906   : > { %p1590_p6 = scmp.ne.s32.totalorder %s1906_s24, %s1589_s8  ;;  %p1594_p10 = scmp.lt.u32.totalorder %s1906_s24, %s1959_s5 }
 0x907   : > { %p1595_p11 = scmp.lt.u32.totalorder %s1593_s11, %s1589_s8  ;;  %p1597_p13 = scmp.lt.u32.totalorder %s1589_s8, %s1906_s24 }
 0x908   : > { %p1591_p7 = pnand %p1590_p6, %p1739_p4 }
 0x909   : > { %p1596_p12 = por %p1595_p11, %p1594_p10 }
 0x90a   : > { %p1592_p9 = pneg %p1591_p7 }
 0x90b   : > { %p1598_p0 = por %p1597_p13, %p1596_p12 }
 0x90d   : > { %p1599_p1 = pnand %p1598_p0, %p1592_p9 }
 0x90f   : > { %1602 = shalt.err (!%p1599_p1)
}
 0x910   : > { %1491 = dma.vmem_to_hbm [thread:$0]  (%p1739_p4), %s1908_s15, 128, %s1906_s24, %s1216_s25  }
 0x911 PF: > { %p1497_p2 = scmp.ge.s32.totalorder %s1653_s23, 2  ;;  %s1242_s14 = sand.u32 1, %s1633_s18  }
 0x912   : > { %s1243_s16 = scalar_lea.sflag [#allocation4], %s1242_s14 }
 0x913   : > { %p1494_p3 = pnand %p1497_p2, %p1746_p8 }
 0x915   : > { %1628 = dma.done.wait (!%p1494_p3), %s1243_s16, 128  }
 0x916   : > { %1630 = vsyncadd (!%p1494_p3), %s1243_s16, 4294967168  ;;  %s18_s23 = sadd.s32 1, %s1653_s23   ;;  %s1964_s18 = smov %s1637_s19 }
 0x917   : > { %p15_p5 = scmp.ge.s32.totalorder %s18_s23, 4   ;;  %s1965_s19 = smov %s1641_s20 }
 0x918   : > { %s1966_s20 = smov %s1752_s6  ;;  %s1967_s21 = smov %s1649_s22 }
 0x919   : > { %s1968_s22 = smov %s1970_s26  ;;  %17 = sbr.rel (!%p15_p5) target bundleno = 4 (0x4), region = 80 }
 0x920   :  { %1248 = vsyncpa [#allocation4], 1 }
 0x921   :  { %1250 = vsyncpa [#allocation4 + $0x1], 1 }

</bundles_post_ra>
